<compile_context>
chip_gen: v7x
topology: tpu7x:2x2x1
jax: 0.10.0
libtpu: 0.0.40
codegen_flags: <defaults>
</compile_context>

<pallas_src>
import functools

import jax
import jax.numpy as jnp
from jax.experimental import pallas as pl
from jax.experimental.pallas import tpu as pltpu


def fused_cnn_kernel(x_ref, w1_ref, b1_ref, wl_ref, bl_ref, fcw_ref, fcb_ref,
                     o_ref, *, n_extra, n_seq, seq_len, conv_dim):
    N, L, C = n_seq, seq_len, conv_dim
    NL = N * L

    # Hoisted boundary masks (one iota, reused by every shift in every layer).
    lane = jax.lax.broadcasted_iota(jnp.int32, (1, NL), 1)
    keep_prev = (lane >= N).astype(jnp.float32)       # zeroes positions with l == 0
    keep_next = (lane < NL - N).astype(jnp.float32)   # zeroes positions with l == L-1

    def sh_prev(a):   # a[..., l-1], zero padded (conv pad / post-ReLU pool pad)
        return pltpu.roll(a, shift=N, axis=1) * keep_prev

    def sh_next(a):   # a[..., l+1], zero padded
        return pltpu.roll(a, shift=NL - N, axis=1) * keep_next

    def maxpool3(a):  # a >= 0 (post-ReLU), so zero padding == -inf padding
        return jnp.maximum(jnp.maximum(sh_prev(a), a), sh_next(a))

    x = x_ref[...]                                    # (1, N*L), lane = l*N + n
    w1 = w1_ref[...]                                  # (C, 3)

    # conv1: Conv1d(1, C, k=3, pad=1) -> broadcast multiplies (Cin == 1).
    h = (w1[:, 0:1] * sh_prev(x) + w1[:, 1:2] * x + w1[:, 2:3] * sh_next(x)
         + b1_ref[...])                               # (C, N*L)
    h = maxpool3(jnp.maximum(h, 0.0))

    # conv stack: one fused-tap MXU matmul per layer.
    for i in range(n_extra):
        hstack = jnp.concatenate([sh_prev(h), h, sh_next(h)], axis=0)  # (3C, N*L)
        y = (jnp.dot(wl_ref[i], hstack, preferred_element_type=jnp.float32)
             + bl_ref[i])                             # (C, N*L)
        h = maxpool3(jnp.maximum(y, 0.0))

    # Fused FC: restack h (C, N*L) -> (L*C, N) with row index l*C + c, then one
    # matmul with the column-permuted fc weight (prepared in the wrapper).
    hfc = jnp.concatenate([h[:, l * N:(l + 1) * N] for l in range(L)], axis=0)
    o_ref[...] = (jnp.dot(fcw_ref[...], hfc, preferred_element_type=jnp.float32)
                  + fcb_ref[...])                     # (L, N) == y^T


def cnn_forecaster_forward(x, params):
    """x: (B, 4, L) float32 (PyTorch NCL layout). Returns (B, 4, L)."""
    conv1_w, conv1_b, convs_w, convs_b, fc_w, fc_b = params
    B, num_slices, L = x.shape
    C = conv1_w.shape[0]                              # conv_dim
    n_extra = convs_w.shape[0]                        # num_layers - 1
    N = num_slices * B
    NL = N * L

    # Parameter relayouts (plain JAX glue, executed once).
    w1_k = conv1_w[:, 0, :]                           # (C, 3)
    b1_k = conv1_b[:, None]                           # (C, 1)
    # (n_extra, Cout, Cin, 3) -> (n_extra, Cout, 3*Cin), columns tap-major.
    wl_k = jnp.transpose(convs_w, (0, 1, 3, 2)).reshape(n_extra, C, 3 * C)
    bl_k = convs_b[:, :, None]                        # (n_extra, C, 1)
    # fc_w: (L, C*L) with column c*L + l  ->  (L, L*C) with column l*C + c.
    fcw_k = jnp.transpose(fc_w.reshape(L, C, L), (0, 2, 1)).reshape(L, L * C)
    fcb_k = fc_b[:, None]                             # (L, 1)

    # (B, 4, L) -> (1, N*L) with lane index l*N + (s*B + b).
    x_lane = jnp.transpose(x, (2, 1, 0)).reshape(1, NL)

    # TODO(synk): on v7x one could split N across the two TensorCores with a
    # 2-way "parallel" grid axis; at these sizes a single invocation is fastest.
    yT = pl.pallas_call(
        functools.partial(fused_cnn_kernel, n_extra=n_extra, n_seq=N,
                          seq_len=L, conv_dim=C),
        out_shape=jax.ShapeDtypeStruct((L, N), jnp.float32),
        grid=(1,),
        in_specs=[
            pl.BlockSpec((1, NL), lambda i: (0, 0)),
            pl.BlockSpec((C, 3), lambda i: (0, 0)),
            pl.BlockSpec((C, 1), lambda i: (0, 0)),
            pl.BlockSpec((n_extra, C, 3 * C), lambda i: (0, 0, 0)),
            pl.BlockSpec((n_extra, C, 1), lambda i: (0, 0, 0)),
            pl.BlockSpec((L, L * C), lambda i: (0, 0)),
            pl.BlockSpec((L, 1), lambda i: (0, 0)),
        ],
        out_specs=pl.BlockSpec((L, N), lambda i: (0, 0)),
        compiler_params=pltpu.CompilerParams(
            dimension_semantics=("arbitrary",)),
    )(x_lane, w1_k, b1_k, wl_k, bl_k, fcw_k, fcb_k)

    # yT[j, s*B + b] -> output[b, s, j]  (matches torch.cat of the 4 slices).
    return jnp.transpose(yT.reshape(L, num_slices, B), (2, 1, 0))


def reference_forward(x, params):
    """Pure-JAX reference reproducing the PyTorch forward (eval mode)."""
    conv1_w, conv1_b, convs_w, convs_b, fc_w, fc_b = params
    B = x.shape[0]

    def conv1d(h, w, b):
        out = jax.lax.conv_general_dilated(
            h, w, window_strides=(1,), padding=[(1, 1)],
            dimension_numbers=("NCH", "OIH", "NCH"),
            precision=jax.lax.Precision.HIGHEST)
        return out + b[None, :, None]

    def maxpool(h):
        return jax.lax.reduce_window(
            h, -jnp.inf, jax.lax.max,
            window_dimensions=(1, 1, 3), window_strides=(1, 1, 1),
            padding=[(0, 0), (0, 0), (1, 1)])

    outs = []
    for s in range(x.shape[1]):
        h = x[:, s, :][:, None, :]
        h = maxpool(jax.nn.relu(conv1d(h, conv1_w, conv1_b)))
        for i in range(convs_w.shape[0]):
            h = maxpool(jax.nn.relu(conv1d(h, convs_w[i], convs_b[i])))
        h = h.reshape(B, -1)
        h = jnp.dot(h, fc_w.T, precision=jax.lax.Precision.HIGHEST) + fc_b
        outs.append(h[:, None, :])
    return jnp.concatenate(outs, axis=1)


if __name__ == "__main__":
    # input_shape = (4, 8) -> x: (B, 4, L); num_layers = L // 2 = 4.
    B, NUM_SLICES, L = 2, 4, 8
    CONV_DIM = 32
    num_layers = L // 2
    n_extra = num_layers - 1

    key = jax.random.PRNGKey(0)
    ks = jax.random.split(key, 7)
    s = 0.1
    conv1_w = s * jax.random.normal(ks[0], (CONV_DIM, 1, 3), jnp.float32)
    conv1_b = s * jax.random.normal(ks[1], (CONV_DIM,), jnp.float32)
    convs_w = s * jax.random.normal(ks[2], (n_extra, CONV_DIM, CONV_DIM, 3),
                                    jnp.float32)
    convs_b = s * jax.random.normal(ks[3], (n_extra, CONV_DIM), jnp.float32)
    fc_w = s * jax.random.normal(ks[4], (L, CONV_DIM * L), jnp.float32)
    fc_b = s * jax.random.normal(ks[5], (L,), jnp.float32)
    x = jax.random.normal(ks[6], (B, NUM_SLICES, L), jnp.float32)

    params = (conv1_w, conv1_b, convs_w, convs_b, fc_w, fc_b)

    out = jax.block_until_ready(cnn_forecaster_forward(x, params))
    ref = reference_forward(x, params)
    assert out.shape == (B, NUM_SLICES, L), out.shape
    err = float(jnp.max(jnp.abs(out - ref)))
    assert err < 5e-3, f"max abs error vs reference: {err}"
    print("KERNEL_OK")
</pallas_src>

<mosaic_0001>
module attributes {stable_mosaic.version = 11 : i64} {
  func.func @fused_cnn_kernel(%arg0: i32, %arg1: memref<1x64xf32, #tpu.memory_space<vmem>>, %arg2: memref<32x3xf32, #tpu.memory_space<vmem>>, %arg3: memref<32x1xf32, #tpu.memory_space<vmem>>, %arg4: memref<3x32x96xf32, #tpu.memory_space<vmem>>, %arg5: memref<3x32x1xf32, #tpu.memory_space<vmem>>, %arg6: memref<8x256xf32, #tpu.memory_space<vmem>>, %arg7: memref<8x1xf32, #tpu.memory_space<vmem>>, %arg8: memref<8x8xf32, #tpu.memory_space<vmem>>) attributes {dimension_semantics = [#tpu.dimension_semantics<arbitrary>], iteration_bounds = array<i64: 1>, scalar_prefetch = 0 : i64, scratch_operands = 0 : i64, tpu.core_type = #tpu.core_type<tc>, window_params = [{pipeline_mode = #tpu.pipeline_mode<synchronous>, transform_indices = @transform_0, window_bounds = array<i64: 1, 64>}, {pipeline_mode = #tpu.pipeline_mode<synchronous>, transform_indices = @transform_1, window_bounds = array<i64: 32, 3>}, {pipeline_mode = #tpu.pipeline_mode<synchronous>, transform_indices = @transform_2, window_bounds = array<i64: 32, 1>}, {pipeline_mode = #tpu.pipeline_mode<synchronous>, transform_indices = @transform_3, window_bounds = array<i64: 3, 32, 96>}, {pipeline_mode = #tpu.pipeline_mode<synchronous>, transform_indices = @transform_4, window_bounds = array<i64: 3, 32, 1>}, {pipeline_mode = #tpu.pipeline_mode<synchronous>, transform_indices = @transform_5, window_bounds = array<i64: 8, 256>}, {pipeline_mode = #tpu.pipeline_mode<synchronous>, transform_indices = @transform_6, window_bounds = array<i64: 8, 1>}, {pipeline_mode = #tpu.pipeline_mode<synchronous>, transform_indices = @transform_7, window_bounds = array<i64: 8, 8>}]} {
    %0 = tpu.iota {dimensions = array<i32: 1>} : vector<1x64xi32>
    %c8_i32 = arith.constant 8 : i32
    %1 = vector.broadcast %c8_i32 : i32 to vector<1x64xi32>
    %2 = arith.cmpi sge, %0, %1 : vector<1x64xi32>
    %3 = arith.extui %2 : vector<1x64xi1> to vector<1x64xi32>
    %4 = arith.sitofp %3 : vector<1x64xi32> to vector<1x64xf32>
    %c56_i32 = arith.constant 56 : i32
    %5 = vector.broadcast %c56_i32 : i32 to vector<1x64xi32>
    %6 = arith.cmpi slt, %0, %5 : vector<1x64xi32>
    %7 = arith.extui %6 : vector<1x64xi1> to vector<1x64xi32>
    %8 = arith.sitofp %7 : vector<1x64xi32> to vector<1x64xf32>
    %c0 = arith.constant 0 : index
    %c0_0 = arith.constant 0 : index
    %9 = vector.load %arg1[%c0, %c0_0] : memref<1x64xf32, #tpu.memory_space<vmem>>, vector<1x64xf32>
    %c0_1 = arith.constant 0 : index
    %c0_2 = arith.constant 0 : index
    %10 = vector.load %arg2[%c0_1, %c0_2] : memref<32x3xf32, #tpu.memory_space<vmem>>, vector<32x3xf32>
    %11 = vector.extract_strided_slice %10 {offsets = [0, 0], sizes = [32, 1], strides = [1, 1]} : vector<32x3xf32> to vector<32x1xf32>
    %c8_i32_3 = arith.constant 8 : i32
    %12 = tpu.dynamic_rotate %9 by %c8_i32_3 dim 1 : vector<1x64xf32>, i32 -> vector<1x64xf32>
    %13 = arith.mulf %12, %4 : vector<1x64xf32>
    %14 = vector.broadcast %11 : vector<32x1xf32> to vector<32x64xf32>
    %15 = vector.broadcast %13 : vector<1x64xf32> to vector<32x64xf32>
    %16 = arith.mulf %14, %15 : vector<32x64xf32>
    %17 = vector.extract_strided_slice %10 {offsets = [0, 1], sizes = [32, 1], strides = [1, 1]} : vector<32x3xf32> to vector<32x1xf32>
    %18 = vector.broadcast %17 : vector<32x1xf32> to vector<32x64xf32>
    %19 = vector.broadcast %9 : vector<1x64xf32> to vector<32x64xf32>
    %20 = arith.mulf %18, %19 : vector<32x64xf32>
    %21 = arith.addf %16, %20 : vector<32x64xf32>
    %22 = vector.extract_strided_slice %10 {offsets = [0, 2], sizes = [32, 1], strides = [1, 1]} : vector<32x3xf32> to vector<32x1xf32>
    %c56_i32_4 = arith.constant 56 : i32
    %23 = tpu.dynamic_rotate %9 by %c56_i32_4 dim 1 : vector<1x64xf32>, i32 -> vector<1x64xf32>
    %24 = arith.mulf %23, %8 : vector<1x64xf32>
    %25 = vector.broadcast %22 : vector<32x1xf32> to vector<32x64xf32>
    %26 = vector.broadcast %24 : vector<1x64xf32> to vector<32x64xf32>
    %27 = arith.mulf %25, %26 : vector<32x64xf32>
    %28 = arith.addf %21, %27 : vector<32x64xf32>
    %c0_5 = arith.constant 0 : index
    %c0_6 = arith.constant 0 : index
    %29 = vector.load %arg3[%c0_5, %c0_6] : memref<32x1xf32, #tpu.memory_space<vmem>>, vector<32x1xf32>
    %30 = vector.broadcast %29 : vector<32x1xf32> to vector<32x64xf32>
    %31 = arith.addf %28, %30 : vector<32x64xf32>
    %cst = arith.constant 0.000000e+00 : f32
    %32 = vector.broadcast %cst : f32 to vector<32x64xf32>
    %33 = arith.maximumf %31, %32 : vector<32x64xf32>
    %c8_i32_7 = arith.constant 8 : i32
    %34 = tpu.dynamic_rotate %33 by %c8_i32_7 dim 1 : vector<32x64xf32>, i32 -> vector<32x64xf32>
    %35 = vector.broadcast %4 : vector<1x64xf32> to vector<32x64xf32>
    %36 = arith.mulf %34, %35 : vector<32x64xf32>
    %37 = arith.maximumf %36, %33 : vector<32x64xf32>
    %c56_i32_8 = arith.constant 56 : i32
    %38 = tpu.dynamic_rotate %33 by %c56_i32_8 dim 1 : vector<32x64xf32>, i32 -> vector<32x64xf32>
    %39 = vector.broadcast %8 : vector<1x64xf32> to vector<32x64xf32>
    %40 = arith.mulf %38, %39 : vector<32x64xf32>
    %41 = arith.maximumf %37, %40 : vector<32x64xf32>
    %c8_i32_9 = arith.constant 8 : i32
    %42 = tpu.dynamic_rotate %41 by %c8_i32_9 dim 1 : vector<32x64xf32>, i32 -> vector<32x64xf32>
    %43 = vector.broadcast %4 : vector<1x64xf32> to vector<32x64xf32>
    %44 = arith.mulf %42, %43 : vector<32x64xf32>
    %c56_i32_10 = arith.constant 56 : i32
    %45 = tpu.dynamic_rotate %41 by %c56_i32_10 dim 1 : vector<32x64xf32>, i32 -> vector<32x64xf32>
    %46 = vector.broadcast %8 : vector<1x64xf32> to vector<32x64xf32>
    %47 = arith.mulf %45, %46 : vector<32x64xf32>
    %48 = tpu.concatenate %44, %41, %47 in 0 : vector<32x64xf32>, vector<32x64xf32>, vector<32x64xf32> -> vector<96x64xf32>
    %c0_11 = arith.constant 0 : index
    %c0_12 = arith.constant 0 : index
    %c0_13 = arith.constant 0 : index
    %49 = vector.load %arg4[%c0_11, %c0_12, %c0_13] : memref<3x32x96xf32, #tpu.memory_space<vmem>>, vector<1x32x96xf32>
    %50 = vector.shape_cast %49 : vector<1x32x96xf32> to vector<32x96xf32>
    %cst_14 = arith.constant dense<0.000000e+00> : vector<32x64xf32>
    %51 = tpu.matmul %50, %48, %cst_14 {dimension_numbers = #tpu.dot_dimension_numbers<[1], [0], [0], [1], [0, 0, 1, 1], [], []>} : vector<32x96xf32>, vector<96x64xf32>, vector<32x64xf32> -> vector<32x64xf32>
    %c0_15 = arith.constant 0 : index
    %c0_16 = arith.constant 0 : index
    %c0_17 = arith.constant 0 : index
    %52 = vector.load %arg5[%c0_15, %c0_16, %c0_17] : memref<3x32x1xf32, #tpu.memory_space<vmem>>, vector<1x32x1xf32>
    %53 = vector.shape_cast %52 : vector<1x32x1xf32> to vector<32x1xf32>
    %54 = vector.broadcast %53 : vector<32x1xf32> to vector<32x64xf32>
    %55 = arith.addf %51, %54 : vector<32x64xf32>
    %cst_18 = arith.constant 0.000000e+00 : f32
    %56 = vector.broadcast %cst_18 : f32 to vector<32x64xf32>
    %57 = arith.maximumf %55, %56 : vector<32x64xf32>
    %c8_i32_19 = arith.constant 8 : i32
    %58 = tpu.dynamic_rotate %57 by %c8_i32_19 dim 1 : vector<32x64xf32>, i32 -> vector<32x64xf32>
    %59 = vector.broadcast %4 : vector<1x64xf32> to vector<32x64xf32>
    %60 = arith.mulf %58, %59 : vector<32x64xf32>
    %61 = arith.maximumf %60, %57 : vector<32x64xf32>
    %c56_i32_20 = arith.constant 56 : i32
    %62 = tpu.dynamic_rotate %57 by %c56_i32_20 dim 1 : vector<32x64xf32>, i32 -> vector<32x64xf32>
    %63 = vector.broadcast %8 : vector<1x64xf32> to vector<32x64xf32>
    %64 = arith.mulf %62, %63 : vector<32x64xf32>
    %65 = arith.maximumf %61, %64 : vector<32x64xf32>
    %c8_i32_21 = arith.constant 8 : i32
    %66 = tpu.dynamic_rotate %65 by %c8_i32_21 dim 1 : vector<32x64xf32>, i32 -> vector<32x64xf32>
    %67 = vector.broadcast %4 : vector<1x64xf32> to vector<32x64xf32>
    %68 = arith.mulf %66, %67 : vector<32x64xf32>
    %c56_i32_22 = arith.constant 56 : i32
    %69 = tpu.dynamic_rotate %65 by %c56_i32_22 dim 1 : vector<32x64xf32>, i32 -> vector<32x64xf32>
    %70 = vector.broadcast %8 : vector<1x64xf32> to vector<32x64xf32>
    %71 = arith.mulf %69, %70 : vector<32x64xf32>
    %72 = tpu.concatenate %68, %65, %71 in 0 : vector<32x64xf32>, vector<32x64xf32>, vector<32x64xf32> -> vector<96x64xf32>
    %c1 = arith.constant 1 : index
    %c0_23 = arith.constant 0 : index
    %c0_24 = arith.constant 0 : index
    %73 = vector.load %arg4[%c1, %c0_23, %c0_24] : memref<3x32x96xf32, #tpu.memory_space<vmem>>, vector<1x32x96xf32>
    %74 = vector.shape_cast %73 : vector<1x32x96xf32> to vector<32x96xf32>
    %cst_25 = arith.constant dense<0.000000e+00> : vector<32x64xf32>
    %75 = tpu.matmul %74, %72, %cst_25 {dimension_numbers = #tpu.dot_dimension_numbers<[1], [0], [0], [1], [0, 0, 1, 1], [], []>} : vector<32x96xf32>, vector<96x64xf32>, vector<32x64xf32> -> vector<32x64xf32>
    %c1_26 = arith.constant 1 : index
    %c0_27 = arith.constant 0 : index
    %c0_28 = arith.constant 0 : index
    %76 = vector.load %arg5[%c1_26, %c0_27, %c0_28] : memref<3x32x1xf32, #tpu.memory_space<vmem>>, vector<1x32x1xf32>
    %77 = vector.shape_cast %76 : vector<1x32x1xf32> to vector<32x1xf32>
    %78 = vector.broadcast %77 : vector<32x1xf32> to vector<32x64xf32>
    %79 = arith.addf %75, %78 : vector<32x64xf32>
    %cst_29 = arith.constant 0.000000e+00 : f32
    %80 = vector.broadcast %cst_29 : f32 to vector<32x64xf32>
    %81 = arith.maximumf %79, %80 : vector<32x64xf32>
    %c8_i32_30 = arith.constant 8 : i32
    %82 = tpu.dynamic_rotate %81 by %c8_i32_30 dim 1 : vector<32x64xf32>, i32 -> vector<32x64xf32>
    %83 = vector.broadcast %4 : vector<1x64xf32> to vector<32x64xf32>
    %84 = arith.mulf %82, %83 : vector<32x64xf32>
    %85 = arith.maximumf %84, %81 : vector<32x64xf32>
    %c56_i32_31 = arith.constant 56 : i32
    %86 = tpu.dynamic_rotate %81 by %c56_i32_31 dim 1 : vector<32x64xf32>, i32 -> vector<32x64xf32>
    %87 = vector.broadcast %8 : vector<1x64xf32> to vector<32x64xf32>
    %88 = arith.mulf %86, %87 : vector<32x64xf32>
    %89 = arith.maximumf %85, %88 : vector<32x64xf32>
    %c8_i32_32 = arith.constant 8 : i32
    %90 = tpu.dynamic_rotate %89 by %c8_i32_32 dim 1 : vector<32x64xf32>, i32 -> vector<32x64xf32>
    %91 = vector.broadcast %4 : vector<1x64xf32> to vector<32x64xf32>
    %92 = arith.mulf %90, %91 : vector<32x64xf32>
    %c56_i32_33 = arith.constant 56 : i32
    %93 = tpu.dynamic_rotate %89 by %c56_i32_33 dim 1 : vector<32x64xf32>, i32 -> vector<32x64xf32>
    %94 = vector.broadcast %8 : vector<1x64xf32> to vector<32x64xf32>
    %95 = arith.mulf %93, %94 : vector<32x64xf32>
    %96 = tpu.concatenate %92, %89, %95 in 0 : vector<32x64xf32>, vector<32x64xf32>, vector<32x64xf32> -> vector<96x64xf32>
    %c2 = arith.constant 2 : index
    %c0_34 = arith.constant 0 : index
    %c0_35 = arith.constant 0 : index
    %97 = vector.load %arg4[%c2, %c0_34, %c0_35] : memref<3x32x96xf32, #tpu.memory_space<vmem>>, vector<1x32x96xf32>
    %98 = vector.shape_cast %97 : vector<1x32x96xf32> to vector<32x96xf32>
    %cst_36 = arith.constant dense<0.000000e+00> : vector<32x64xf32>
    %99 = tpu.matmul %98, %96, %cst_36 {dimension_numbers = #tpu.dot_dimension_numbers<[1], [0], [0], [1], [0, 0, 1, 1], [], []>} : vector<32x96xf32>, vector<96x64xf32>, vector<32x64xf32> -> vector<32x64xf32>
    %c2_37 = arith.constant 2 : index
    %c0_38 = arith.constant 0 : index
    %c0_39 = arith.constant 0 : index
    %100 = vector.load %arg5[%c2_37, %c0_38, %c0_39] : memref<3x32x1xf32, #tpu.memory_space<vmem>>, vector<1x32x1xf32>
    %101 = vector.shape_cast %100 : vector<1x32x1xf32> to vector<32x1xf32>
    %102 = vector.broadcast %101 : vector<32x1xf32> to vector<32x64xf32>
    %103 = arith.addf %99, %102 : vector<32x64xf32>
    %cst_40 = arith.constant 0.000000e+00 : f32
    %104 = vector.broadcast %cst_40 : f32 to vector<32x64xf32>
    %105 = arith.maximumf %103, %104 : vector<32x64xf32>
    %c8_i32_41 = arith.constant 8 : i32
    %106 = tpu.dynamic_rotate %105 by %c8_i32_41 dim 1 : vector<32x64xf32>, i32 -> vector<32x64xf32>
    %107 = vector.broadcast %4 : vector<1x64xf32> to vector<32x64xf32>
    %108 = arith.mulf %106, %107 : vector<32x64xf32>
    %109 = arith.maximumf %108, %105 : vector<32x64xf32>
    %c56_i32_42 = arith.constant 56 : i32
    %110 = tpu.dynamic_rotate %105 by %c56_i32_42 dim 1 : vector<32x64xf32>, i32 -> vector<32x64xf32>
    %111 = vector.broadcast %8 : vector<1x64xf32> to vector<32x64xf32>
    %112 = arith.mulf %110, %111 : vector<32x64xf32>
    %113 = arith.maximumf %109, %112 : vector<32x64xf32>
    %114 = vector.extract_strided_slice %113 {offsets = [0, 0], sizes = [32, 8], strides = [1, 1]} : vector<32x64xf32> to vector<32x8xf32>
    %115 = vector.extract_strided_slice %113 {offsets = [0, 8], sizes = [32, 8], strides = [1, 1]} : vector<32x64xf32> to vector<32x8xf32>
    %116 = vector.extract_strided_slice %113 {offsets = [0, 16], sizes = [32, 8], strides = [1, 1]} : vector<32x64xf32> to vector<32x8xf32>
    %117 = vector.extract_strided_slice %113 {offsets = [0, 24], sizes = [32, 8], strides = [1, 1]} : vector<32x64xf32> to vector<32x8xf32>
    %118 = vector.extract_strided_slice %113 {offsets = [0, 32], sizes = [32, 8], strides = [1, 1]} : vector<32x64xf32> to vector<32x8xf32>
    %119 = vector.extract_strided_slice %113 {offsets = [0, 40], sizes = [32, 8], strides = [1, 1]} : vector<32x64xf32> to vector<32x8xf32>
    %120 = vector.extract_strided_slice %113 {offsets = [0, 48], sizes = [32, 8], strides = [1, 1]} : vector<32x64xf32> to vector<32x8xf32>
    %121 = vector.extract_strided_slice %113 {offsets = [0, 56], sizes = [32, 8], strides = [1, 1]} : vector<32x64xf32> to vector<32x8xf32>
    %122 = tpu.concatenate %114, %115, %116, %117, %118, %119, %120, %121 in 0 : vector<32x8xf32>, vector<32x8xf32>, vector<32x8xf32>, vector<32x8xf32>, vector<32x8xf32>, vector<32x8xf32>, vector<32x8xf32>, vector<32x8xf32> -> vector<256x8xf32>
    %c0_43 = arith.constant 0 : index
    %c0_44 = arith.constant 0 : index
    %123 = vector.load %arg6[%c0_43, %c0_44] : memref<8x256xf32, #tpu.memory_space<vmem>>, vector<8x256xf32>
    %cst_45 = arith.constant dense<0.000000e+00> : vector<8x8xf32>
    %124 = tpu.matmul %123, %122, %cst_45 {dimension_numbers = #tpu.dot_dimension_numbers<[1], [0], [0], [1], [0, 0, 1, 1], [], []>} : vector<8x256xf32>, vector<256x8xf32>, vector<8x8xf32> -> vector<8x8xf32>
    %c0_46 = arith.constant 0 : index
    %c0_47 = arith.constant 0 : index
    %125 = vector.load %arg7[%c0_46, %c0_47] : memref<8x1xf32, #tpu.memory_space<vmem>>, vector<8x1xf32>
    %126 = vector.broadcast %125 : vector<8x1xf32> to vector<8x8xf32>
    %127 = arith.addf %124, %126 : vector<8x8xf32>
    %c0_48 = arith.constant 0 : index
    %c0_49 = arith.constant 0 : index
    %128 = vector.load %arg8[%c0_48, %c0_49] : memref<8x8xf32, #tpu.memory_space<vmem>>, vector<8x8xf32>
    tpu.vector_store %arg8[%c0_48, %c0_49], %127 {strides = array<i32>} : memref<8x8xf32, #tpu.memory_space<vmem>>, vector<8x8xf32>,
    return
  }
  func.func @transform_0(%arg0: i32) -> (i32, i32) {
    %c0_i32 = arith.constant 0 : i32
    %c0_i32_0 = arith.constant 0 : i32
    %c0_i32_1 = arith.constant 0 : i32
    return %c0_i32, %c0_i32_0 : i32, i32
  }
  func.func @transform_1(%arg0: i32) -> (i32, i32) {
    %c0_i32 = arith.constant 0 : i32
    %c0_i32_0 = arith.constant 0 : i32
    %c0_i32_1 = arith.constant 0 : i32
    return %c0_i32, %c0_i32_0 : i32, i32
  }
  func.func @transform_2(%arg0: i32) -> (i32, i32) {
    %c0_i32 = arith.constant 0 : i32
    %c0_i32_0 = arith.constant 0 : i32
    %c0_i32_1 = arith.constant 0 : i32
    return %c0_i32, %c0_i32_0 : i32, i32
  }
  func.func @transform_3(%arg0: i32) -> (i32, i32, i32) {
    %c0_i32 = arith.constant 0 : i32
    %c0_i32_0 = arith.constant 0 : i32
    %c0_i32_1 = arith.constant 0 : i32
    %c0_i32_2 = arith.constant 0 : i32
    return %c0_i32, %c0_i32_0, %c0_i32_1 : i32, i32, i32
  }
  func.func @transform_4(%arg0: i32) -> (i32, i32, i32) {
    %c0_i32 = arith.constant 0 : i32
    %c0_i32_0 = arith.constant 0 : i32
    %c0_i32_1 = arith.constant 0 : i32
    %c0_i32_2 = arith.constant 0 : i32
    return %c0_i32, %c0_i32_0, %c0_i32_1 : i32, i32, i32
  }
  func.func @transform_5(%arg0: i32) -> (i32, i32) {
    %c0_i32 = arith.constant 0 : i32
    %c0_i32_0 = arith.constant 0 : i32
    %c0_i32_1 = arith.constant 0 : i32
    return %c0_i32, %c0_i32_0 : i32, i32
  }
  func.func @transform_6(%arg0: i32) -> (i32, i32) {
    %c0_i32 = arith.constant 0 : i32
    %c0_i32_0 = arith.constant 0 : i32
    %c0_i32_1 = arith.constant 0 : i32
    return %c0_i32, %c0_i32_0 : i32, i32
  }
  func.func @transform_7(%arg0: i32) -> (i32, i32) {
    %c0_i32 = arith.constant 0 : i32
    %c0_i32_0 = arith.constant 0 : i32
    %c0_i32_1 = arith.constant 0 : i32
    return %c0_i32, %c0_i32_0 : i32, i32
  }
}

</mosaic_0001>

<bundles_post_ra>
// kernel: tpu_custom_call.1
= control target key start
LH: loop header
LB: loop body
LE: loop exit
PB: predicated region body
PF: predicated region fallthrough
CT: control target
= control target key end

     0   :  { %v1998_v2 = vmov 1   ;;  %s1999_s28 = smov 64   ;;  %s2525_s0 = inlined_call_operand.vmem [shape: f32[1,64], index: 0, kind: input, shape index: {}]   ;;  %s2526_s1 = inlined_call_operand.vmem [shape: f32[32,3], index: 1, kind: input, shape index: {}]   ;;  %s2527_s2 = inlined_call_operand.vmem [shape: f32[32,1], index: 2, kind: input, shape index: {}]   ;;  %s2528_s3 = inlined_call_operand.vmem [shape: f32[3,32,96], index: 3, kind: input, shape index: {}]   ;;  %s2529_s4 = inlined_call_operand.vmem [shape: f32[3,32,1], index: 4, kind: input, shape index: {}]   ;;  %s2530_s5 = inlined_call_operand.vmem [shape: f32[8,256], index: 5, kind: input, shape index: {}]   ;;  %s2531_s6 = inlined_call_operand.vmem [shape: f32[8,1], index: 6, kind: input, shape index: {}]   ;;  %s2532_s7 = inlined_call_operand.hbm [shape: f32[8,8], index: 7, kind: output, shape index: {}]  }
   0x1   :  { %v2057_v0 = vld [vmem:[%s2525_s0] sm:$0x1]  ;;  %v37_v1 = vld [vmem:[%s2526_s1 + $0x8] sm:$0xff]  ;;  %1717 = vset.pattern.permute.xlu1 %v1998_v2  ;;  %1716 = vset.pattern.permute.xlu0 %v1998_v2 }
   0x2   :  { %41 = vrot.lane.b32.xlu0 %v2057_v0, %s1999_s28  ;;  %85 = vperm.xlu1 %1717, %v37_v1   ;;  %v36_v3 = vld [vmem:[%s2526_s1] sm:$0xff] }
   0x3   :  { %12 = vsyncpa [#allocation3], 0  ;;  %v2000_v4 = vmov 2   ;;  %v39_v5 = vld [vmem:[%s2526_s1 + $0x18] sm:$0xff]  ;;  %v27_v6 = vlaneseq  ;;  %v38_v8 = vld [vmem:[%s2526_s1 + $0x10] sm:$0xff]  ;;  %v2001_v9 = vmov 0.0  }
   0x4   :  { %s2002_s11 = smov 8   ;;  %v2003_v11 = vmov 0   ;;  %s2004_s12 = smov 56   ;;  %v175_v13 = vld [vmem:[%s2527_s2] sm:$0xff]  ;;  %v177_v14 = vld [vmem:[%s2527_s2 + $0x10] sm:$0xff]  ;;  %vm40_vm2 = vcmask 1048064  }
   0x5   :  { %v28_v7 = vand.u32 127, %v27_v6  ;;  %v73_v17 = vshrl.u32 %v27_v6, 7  ;;  %v176_v21 = vld [vmem:[%s2527_s2 + $0x8] sm:$0xff]  ;;  %v178_v25 = vld [vmem:[%s2527_s2 + $0x18] sm:$0xff]  ;;  %s2005_s2 = smov 48   ;;  %s2006_s20 = smov 72  }
   0x6   :  { %81 = vperm.xlu0 %1716, %v36_v3   ;;  %1718 = vset.pattern.permute.xlu1 %v2000_v4  ;;  %vm395_vm3 = vcmask 785408   ;;  %s2011_s24 = smov 112   ;;  %s2012_s25 = smov 104   ;;  %vm1377_vm4 = vcmask 64512  }
   0x7   :  { %132 = vperm.xlu1 %1718, %v36_v3   ;;  %vm32_vm0 = vcmp.lt.s32.totalorder %v28_v7, 56  ;;  %vm29_vm1 = vcmp.ge.s32.totalorder %v28_v7, 8  ;;  %v74_v18 = vsub.s32 0, %v73_v17  ;;  %s2013_s0 = smov [#allocation2]  }
   0x8   :  { %v1394_v10 = vsel %vm32_vm0, 1.0, %v2001_v9  ;;  %v1393_v12 = vsel %vm29_vm1, 1.0, %v2001_v9  ;;  %s1385_s8 = sshll.u32 %s2013_s0, 4  ;;  %s1386_s8 = int_to_ptr.vmem [resolvable:$true] %s1385_s8 }
   0x9   :  { %v100_v20 = vrot.slane %v2057_v0, %v74_v18  ;;  %s1974_s9 = scalar_lea.vmem %s1386_s8, 128  ;;  %p1979_p1 = scmp.lt.s32.totalorder %s1386_s8, %s1386_s8 }
   0xa   :  { %93 = vperm.xlu0 %1716, %v39_v5   ;;  %p1975_p0 = scmp.ne.s32.totalorder %s1386_s8, %s1974_s9  ;;  %p1980_p2 = scmp.lt.s32.totalorder %s1974_s9, %s1974_s9 }
   0xb   :  { %136 = vperm.xlu1 %1718, %v37_v1  }
   0xc   :  { %p1981_p3 = por %p1980_p2, %p1979_p1 }
   0xe   :  { %1720 = vset.pattern.permute.xlu0 %v2000_v4  ;;  %p1982_p4 = pnand %p1981_p3, %p1975_p0 }
   0xf   :  { %1719 = vset.pattern.permute.xlu1 %v1998_v2 }
  0x10   :  { %89 = vperm.xlu1 %1719, %v38_v8  }
  0x14   :  { %127 = vrot.lane.b32.xlu1 %v1394_v10, %s2002_s11 }
  0x15   :  { %1721 = vset.pattern.permute.xlu1 %v2000_v4 }
  0x18   :  { %144 = vperm.xlu1 %1721, %v39_v5  }
  0x1c   :  { %1722 = vset.pattern.permute.xlu1 %v2003_v11 }
  0x1d   :  { %54 = vperm.xlu1 %1722, %v36_v3  }
  0x21   :  { %48 = vrot.lane.b32.xlu1 %v1393_v12, %s2004_s12 }
  0x25   :  { %64 = vperm.xlu1 %1722, %v38_v8  }
  0x29   :  { %181 = vperm.xlu1 %1722, %v175_v13  }
  0x2d   :  { %191 = vperm.xlu1 %1722, %v177_v14  }
  0x74   :  { %v42_v15 = vpop.permute.xlu0 %41 }
  0x75   :  { %v43_v16 = vsel %vm40_vm2, %v42_v15, %v2057_v0 }
  0x76   :  { %44 = vrot.lane.b32.xlu0 %v43_v16, %s1999_s28 }
  0x7a   :  { %140 = vperm.xlu0 %1720, %v38_v8  }
  0x7e   :  { %1723 = vset.pattern.permute.xlu0 %v2003_v11 }
  0x7f   :  { %59 = vperm.xlu0 %1723, %v37_v1  }
  0x81   :  { %v86_v19 = vpop.permute.xlu1 %85 }
  0x82   :  { %v103_v26 = vmul.f32 %v100_v20, %v86_v19 }
  0x83   :  { %69 = vperm.xlu0 %1723, %v39_v5  }
  0x85   :  { %v82_v22 = vpop.permute.xlu0 %81 }
  0x86   :  { %v102_v23 = vmul.f32 %v100_v20, %v82_v22  ;;  %v133_v24 = vpop.permute.xlu1 %132 }
  0x87   :  { %186 = vperm.xlu0 %1723, %v176_v21  }
  0x88   :  { %110 = vrot.lane.b32.xlu1 %v102_v23, %s2004_s12 }
  0x89   :  { %v94_v28 = vpop.permute.xlu0 %93 }
  0x8a   :  { %v137_v27 = vpop.permute.xlu1 %136  ;;  %v105_v29 = vmul.f32 %v100_v20, %v94_v28 }
  0x8b   :  { %196 = vperm.xlu0 %1723, %v178_v25  }
  0x8f   :  { %112 = vrot.lane.b32.xlu0 %v103_v26, %s2004_s12  ;;  %v90_v30 = vpop.permute.xlu1 %89 }
  0x90   :  { %v104_v31 = vmul.f32 %v100_v20, %v90_v30 }
  0x92   :  { %114 = vrot.lane.b32.xlu1 %v104_v31, %s2004_s12 }
  0x93   :  { %116 = vrot.lane.b32.xlu0 %v105_v29, %s2004_s12  ;;  %v2094_v33 = vpop.permute.xlu1 %127 }
  0x97   :  { %v145_v39 = vpop.permute.xlu1 %144 }
  0x9c   :  { %v55_v43 = vpop.permute.xlu1 %54 }
  0xa0   :  { %v2103_v45 = vpop.permute.xlu1 %48 }
  0xa4   :  { %v65_v47 = vpop.permute.xlu1 %64 }
  0xa8   :  { %v182_v49 = vpop.permute.xlu1 %181 }
  0xac   :  { %v192_v51 = vpop.permute.xlu1 %191 }
  0xe8   :  { %v45_v32 = vpop.permute.xlu0 %44 }
  0xe9   :  { %v46_v34 = vsel %vm40_vm2, %v45_v32, %v2057_v0 }
  0xea   :  { %v130_v35 = vmul.f32 %v2094_v33, %v46_v34  ;;  %v51_v52 = vmul.f32 %v2103_v45, %v46_v34 }
  0xec   :  { %v150_v36 = vrot.slane %v130_v35, %v74_v18  ;;  %v75_v55 = vrot.slane %v51_v52, %v74_v18 }
  0xee   :  { %v152_v37 = vmul.f32 %v150_v36, %v137_v27  ;;  %v151_v38 = vmul.f32 %v150_v36, %v133_v24  ;;  %v154_v40 = vmul.f32 %v150_v36, %v145_v39  ;;  %v76_v58 = vmul.f32 %v75_v55, %v55_v43 }
  0xef   :  { %v78_v11 = vmul.f32 %v75_v55, %v65_v47 }
  0xf0   :  { %161 = vrot.lane.b32.xlu0 %v152_v37, %s2005_s2  ;;  %159 = vrot.lane.b32.xlu1 %v151_v38, %s2005_s2 }
  0xf4   :  { %165 = vrot.lane.b32.xlu0 %v154_v40, %s2005_s2 }
  0xf9   :  { %v141_v41 = vpop.permute.xlu0 %140 }
  0xfa   :  { %v153_v42 = vmul.f32 %v150_v36, %v141_v41  ;;  %v111_v54 = vpop.permute.xlu1 %110 }
  0xfb   :  { %v122_v60 = vadd.f32 %v111_v54, %v76_v58 }
  0xfc   :  { %163 = vrot.lane.b32.xlu1 %v153_v42, %s2005_s2 }
  0xfe   :  { %v60_v44 = vpop.permute.xlu0 %59 }
  0xff   :  { %v77_v59 = vmul.f32 %v75_v55, %v60_v44 }
 0x102   :  { %v70_v46 = vpop.permute.xlu0 %69 }
 0x103   :  { %v79_v0 = vmul.f32 %v75_v55, %v70_v46 }
 0x104   :  { %v115_v56 = vpop.permute.xlu1 %114 }
 0x105   :  { %v124_v13 = vadd.f32 %v115_v56, %v78_v11 }
 0x106   :  { %v187_v48 = vpop.permute.xlu0 %186 }
 0x10a   :  { %v197_v50 = vpop.permute.xlu0 %196 }
 0x10e   :  { %v113_v53 = vpop.permute.xlu0 %112 }
 0x10f   :  { %v123_v61 = vadd.f32 %v113_v53, %v77_v59 }
 0x112   :  { %v117_v57 = vpop.permute.xlu0 %116 }
 0x113   :  { %v125_v3 = vadd.f32 %v117_v57, %v79_v0 }
 0x162   :  { %v162_v62 = vpop.permute.xlu0 %161  ;;  %v160_v63 = vpop.permute.xlu1 %159 }
 0x163   :  { %v172_v1 = vadd.f32 %v162_v62, %v123_v61  ;;  %v171_v2 = vadd.f32 %v160_v63, %v122_v60 }
 0x165   :  { %v200_v4 = vadd.f32 %v187_v48, %v172_v1  ;;  %v199_v5 = vadd.f32 %v182_v49, %v171_v2 }
 0x166   :  { %v166_v6 = vpop.permute.xlu0 %165 }
 0x167   :  { %v174_v7 = vadd.f32 %v166_v6, %v125_v3  ;;  %v204_v8 = vmax.f32 %v200_v4, 0.0  ;;  %v203_v9 = vmax.f32 %v199_v5, 0.0 }
 0x169   :  { %v202_v10 = vadd.f32 %v197_v50, %v174_v7  ;;  %213 = vrot.lane.b32.xlu0 %v204_v8, %s2006_s20  ;;  %211 = vrot.lane.b32.xlu1 %v203_v9, %s2006_s20 }
 0x16b   :  { %v206_v12 = vmax.f32 %v202_v10, 0.0 }
 0x16d   :  { %217 = vrot.lane.b32.xlu0 %v206_v12, %s2006_s20 }
 0x16e   :  { %v164_v14 = vpop.permute.xlu1 %163 }
 0x16f   :  { %v173_v15 = vadd.f32 %v164_v14, %v124_v13 }
 0x171   :  { %v201_v16 = vadd.f32 %v192_v51, %v173_v15 }
 0x173   :  { %v205_v17 = vmax.f32 %v201_v16, 0.0 }
 0x175   :  { %215 = vrot.lane.b32.xlu1 %v205_v17, %s2006_s20 }
 0x1db   :  { %v214_v18 = vpop.permute.xlu0 %213  ;;  %v212_v19 = vpop.permute.xlu1 %211 }
 0x1dc   :  { %226 = vrot.lane.b32.xlu0 %v214_v18, %s1999_s28  ;;  %223 = vrot.lane.b32.xlu1 %v212_v19, %s1999_s28 }
 0x1df   :  { %v218_v20 = vpop.permute.xlu0 %217 }
 0x1e0   :  { %232 = vrot.lane.b32.xlu0 %v218_v20, %s1999_s28 }
 0x1e7   :  { %v216_v21 = vpop.permute.xlu1 %215 }
 0x1e8   :  { %229 = vrot.lane.b32.xlu1 %v216_v21, %s1999_s28 }
 0x24e   :  { %v227_v22 = vpop.permute.xlu0 %226  ;;  %v224_v23 = vpop.permute.xlu1 %223 }
 0x24f   :  { %v228_v24 = vsel %vm40_vm2, %v227_v22, %v214_v18  ;;  %v225_v25 = vsel %vm40_vm2, %v224_v23, %v212_v19 }
 0x250   :  { %237 = vrot.lane.b32.xlu0 %v228_v24, %s1999_s28  ;;  %235 = vrot.lane.b32.xlu1 %v225_v25, %s1999_s28 }
 0x252   :  { %v233_v26 = vpop.permute.xlu0 %232 }
 0x253   :  { %v234_v27 = vsel %vm40_vm2, %v233_v26, %v218_v20 }
 0x254   :  { %241 = vrot.lane.b32.xlu0 %v234_v27, %s1999_s28 }
 0x25a   :  { %v230_v28 = vpop.permute.xlu1 %229 }
 0x25b   :  { %v231_v29 = vsel %vm40_vm2, %v230_v28, %v216_v21 }
 0x25c   :  { %239 = vrot.lane.b32.xlu1 %v231_v29, %s1999_s28 }
 0x2c2   :  { %v238_v30 = vpop.permute.xlu0 %237  ;;  %v236_v31 = vpop.permute.xlu1 %235 }
 0x2c3   :  { %v244_v32 = vsel %vm40_vm2, %v238_v30, %v214_v18  ;;  %v243_v34 = vsel %vm40_vm2, %v236_v31, %v212_v19 }
 0x2c4   :  { %v256_v35 = vmul.f32 %v244_v32, %v2094_v33  ;;  %v255_v36 = vmul.f32 %v243_v34, %v2094_v33  ;;  %v248_v43 = vmul.f32 %v244_v32, %v2103_v45  ;;  %v247_v44 = vmul.f32 %v243_v34, %v2103_v45  ;;  %v343_v32 = vld [vmem:[%s2529_s4] sm:$0xff] }
 0x2c6   :  { %265 = vrot.lane.b32.xlu0 %v256_v35, %s2005_s2  ;;  %v242_v37 = vpop.permute.xlu0 %241  ;;  %263 = vrot.lane.b32.xlu1 %v255_v36, %s2005_s2  ;;  %v252_v47 = vmax.f32 %v248_v43, %v204_v8  ;;  %v251_v48 = vmax.f32 %v247_v44, %v203_v9  ;;  %v339_v35 = vld [vmem:[%s2528_s3] sm:$0xff]  ;;  %v345_v36 = vld [vmem:[%s2529_s4 + $0x10] sm:$0xff] }
 0x2c7   :  { %v246_v38 = vsel %vm40_vm2, %v242_v37, %v218_v20  ;;  %1530 = vmatprep.mubr.msk.f32.mxu0 %vm395_vm3, %v339_v35  ;;  %v346_v44 = vld [vmem:[%s2529_s4 + $0x18] sm:$0xff] }
 0x2c8   :  { %v258_v39 = vmul.f32 %v246_v38, %v2094_v33  ;;  %v250_v46 = vmul.f32 %v246_v38, %v2103_v45 }
 0x2ca   :  { %269 = vrot.lane.b32.xlu0 %v258_v39, %s2005_s2  ;;  %v254_v53 = vmax.f32 %v250_v46, %v206_v12 }
 0x2ce   :  { %v240_v40 = vpop.permute.xlu1 %239 }
 0x2cf   :  { %v245_v41 = vsel %vm40_vm2, %v240_v40, %v216_v21 }
 0x2d0   :  { %v257_v42 = vmul.f32 %v245_v41, %v2094_v33  ;;  %v249_v56 = vmul.f32 %v245_v41, %v2103_v45  ;;  %v344_v41 = vld [vmem:[%s2529_s4 + $0x8] sm:$0xff] }
 0x2d2   :  { %267 = vrot.lane.b32.xlu1 %v257_v42, %s2005_s2  ;;  %v253_v57 = vmax.f32 %v249_v56, %v205_v17  ;;  %v341_v56 = vld [vmem:[%s2528_s3 + $0x10] sm:$0xff] }
 0x338   :  { %v266_v49 = vpop.permute.xlu0 %265  ;;  %v264_v50 = vpop.permute.xlu1 %263 }
 0x339   :  { %v276_v51 = vmax.f32 %v252_v47, %v266_v49  ;;  %v275_v52 = vmax.f32 %v251_v48, %v264_v50 }
 0x33b   :  { %285 = vrot.lane.b32.xlu0 %v276_v51, %s2006_s20  ;;  %283 = vrot.lane.b32.xlu1 %v275_v52, %s2006_s20 }
 0x33c   :  { %v270_v54 = vpop.permute.xlu0 %269 }
 0x33d   :  { %v278_v55 = vmax.f32 %v254_v53, %v270_v54 }
 0x33f   :  { %289 = vrot.lane.b32.xlu0 %v278_v55, %s2006_s20  ;;  %v340_v55 = vld [vmem:[%s2528_s3 + $0x8] sm:$0xff] }
 0x344   :  { %v268_v58 = vpop.permute.xlu1 %267 }
 0x345   :  { %v277_v59 = vmax.f32 %v253_v57, %v268_v58  ;;  %v342_v57 = vld [vmem:[%s2528_s3 + $0x18] sm:$0xff] }
 0x347   :  { %287 = vrot.lane.b32.xlu1 %v277_v59, %s2006_s20 }
 0x3ad   :  { %v2142_v60 = vpop.permute.xlu0 %285  ;;  %v2144_v61 = vpop.permute.xlu1 %283 }
 0x3ae   :  { %298 = vrot.lane.b32.xlu0 %v2142_v60, %s1999_s28  ;;  %295 = vrot.lane.b32.xlu1 %v2144_v61, %s1999_s28  ;;  %v1604_v43 = vpack.c.bf16 %v2142_v60, %v2144_v61 }
 0x3b1   :  { %v2150_v62 = vpop.permute.xlu0 %289 }
 0x3b2   :  { %304 = vrot.lane.b32.xlu0 %v2150_v62, %s1999_s28 }
 0x3b9   :  { %v2154_v63 = vpop.permute.xlu1 %287 }
 0x3ba   :  { %301 = vrot.lane.b32.xlu1 %v2154_v63, %s1999_s28  ;;  %v1608_v46 = vpack.c.bf16 %v2150_v62, %v2154_v63 }
 0x420   :  { %v299_v0 = vpop.permute.xlu0 %298  ;;  %v296_v1 = vpop.permute.xlu1 %295 }
 0x421   :  { %v300_v2 = vsel %vm40_vm2, %v299_v0, %v2142_v60  ;;  %v297_v3 = vsel %vm40_vm2, %v296_v1, %v2144_v61 }
 0x422   :  { %309 = vrot.lane.b32.xlu0 %v300_v2, %s1999_s28  ;;  %307 = vrot.lane.b32.xlu1 %v297_v3, %s1999_s28 }
 0x424   :  { %v305_v4 = vpop.permute.xlu0 %304 }
 0x425   :  { %v306_v5 = vsel %vm40_vm2, %v305_v4, %v2150_v62 }
 0x426   :  { %313 = vrot.lane.b32.xlu0 %v306_v5, %s1999_s28 }
 0x42c   :  { %v302_v6 = vpop.permute.xlu1 %301 }
 0x42d   :  { %v303_v7 = vsel %vm40_vm2, %v302_v6, %v2154_v63 }
 0x42e   :  { %311 = vrot.lane.b32.xlu1 %v303_v7, %s1999_s28 }
 0x494   :  { %v310_v8 = vpop.permute.xlu0 %309  ;;  %v308_v9 = vpop.permute.xlu1 %307 }
 0x495   :  { %v316_v10 = vsel %vm40_vm2, %v310_v8, %v2142_v60  ;;  %v315_v11 = vsel %vm40_vm2, %v308_v9, %v2144_v61 }
 0x496   :  { %v324_v12 = vmul.f32 %v316_v10, %v2094_v33  ;;  %v323_v13 = vmul.f32 %v315_v11, %v2094_v33  ;;  %v320_v14 = vmul.f32 %v316_v10, %v2103_v45  ;;  %v319_v15 = vmul.f32 %v315_v11, %v2103_v45 }
 0x498   :  { %v1724_v16 = vpack.i.bf16 %v324_v12, %v323_v13  ;;  %v314_v17 = vpop.permute.xlu0 %313  ;;  %v1734_v18 = vpack.i.bf16 %v320_v14, %v319_v15 }
 0x499   :  { %v318_v19 = vsel %vm40_vm2, %v314_v17, %v2150_v62 }
 0x49a   :  { %1725 = vrot.lane.b32.xlu1 %v1724_v16, %s2005_s2  ;;  %v326_v22 = vmul.f32 %v318_v19, %v2094_v33  ;;  %v322_v26 = vmul.f32 %v318_v19, %v2103_v45 }
 0x49e   :  { %1735 = vrot.lane.b32.xlu1 %v1734_v18, %s2006_s20 }
 0x4a0   :  { %v312_v20 = vpop.permute.xlu1 %311 }
 0x4a1   :  { %v317_v21 = vsel %vm40_vm2, %v312_v20, %v2154_v63 }
 0x4a2   :  { %v325_v23 = vmul.f32 %v317_v21, %v2094_v33  ;;  %v321_v24 = vmul.f32 %v317_v21, %v2103_v45 }
 0x4a4   :  { %v1729_v25 = vpack.i.bf16 %v326_v22, %v325_v23  ;;  %v1739_v27 = vpack.i.bf16 %v322_v26, %v321_v24 }
 0x4a6   :  { %1730 = vrot.lane.b32.xlu0 %v1729_v25, %s2005_s2 }
 0x4aa   :  { %1740 = vrot.lane.b32.xlu0 %v1739_v27, %s2006_s20 }
 0x50c   :  { %v1726_v28 = vpop.permute.xlu1 %1725 }
 0x50d   :  { %1745 = vrot.lane.b32.xlu1 %v1726_v28, %s2006_s20 }
 0x510   :  { %v1736_v29 = vpop.permute.xlu1 %1735 }
 0x511   :  { %v1738_v30 = vunpack.i.h.bf16 %v1736_v29  ;;  %v1737_v31 = vunpack.i.l.bf16 %v1736_v29  ;;  %349 = vperm.xlu1 %1722, %v343_v32  }
 0x513   :  { %v1596_v34 = vpack.c.bf16 %v1738_v30, %v1737_v31 }
 0x515   :  { %1597 = vmatprep.subr.bf16.mxu0 %v1596_v34  ;;  %359 = vperm.xlu1 %1722, %v345_v36  }
 0x516   :  { %1599 = vmatpush3.bf16.msra.mxu0 %v1596_v34 }
 0x518   :  { %v1731_v37 = vpop.permute.xlu0 %1730 }
 0x519   :  { %1750 = vrot.lane.b32.xlu0 %v1731_v37, %s2006_s20 }
 0x51c   :  { %v1741_v38 = vpop.permute.xlu0 %1740 }
 0x51d   :  { %v1743_v39 = vunpack.i.h.bf16 %v1741_v38  ;;  %v1742_v40 = vunpack.i.l.bf16 %v1741_v38  ;;  %354 = vperm.xlu0 %1723, %v344_v41  }
 0x51f   :  { %v1600_v42 = vpack.c.bf16 %v1743_v39, %v1742_v40 }
 0x521   :  { %1601 = vmatprep.subr.bf16.mxu0 %v1600_v42  ;;  %364 = vperm.xlu0 %1723, %v346_v44  }
 0x522   :  { %1603 = vmatpush3.bf16.msra.mxu0 %v1600_v42 }
 0x523   :  { %1605 = vmatprep.subr.bf16.mxu0 %v1604_v43 }
 0x526   :  { %1607 = vmatpush3.bf16.msra.mxu0 %v1604_v43 }
 0x527   :  { %1609 = vmatprep.subr.bf16.mxu0 %v1608_v46 }
 0x52a   :  { %1611 = vmatpush3.bf16.msra.mxu0 %v1608_v46 }
 0x57f   :  { %v1746_v47 = vpop.permute.xlu1 %1745 }
 0x580   :  { %v1748_v48 = vunpack.i.h.bf16 %v1746_v47  ;;  %v1747_v49 = vunpack.i.l.bf16 %v1746_v47 }
 0x582   :  { %v1612_v50 = vpack.c.bf16 %v1748_v48, %v1747_v49 }
 0x584   :  { %1613 = vmatprep.subr.bf16.mxu0 %v1612_v50 }
 0x585   :  { %1615 = vmatpush3.bf16.msra.mxu0 %v1612_v50 }
 0x58b   :  { %v1751_v51 = vpop.permute.xlu0 %1750 }
 0x58c   :  { %v1753_v52 = vunpack.i.h.bf16 %v1751_v51  ;;  %v1752_v53 = vunpack.i.l.bf16 %v1751_v51 }
 0x58e   :  { %v1616_v54 = vpack.c.bf16 %v1753_v52, %v1752_v53 }
 0x590   :  { %1617 = vmatprep.subr.bf16.mxu0 %v1616_v54  ;;  %v350_v59 = vpop.permute.xlu1 %349 }
 0x591   :  { %1619 = vmatpush3.bf16.msra.mxu0 %v1616_v54 }
 0x594   :  { %1531 = vmatmul.mubr.msk.f32.vlgmr.msra.gmra.mrb[0].mxu0 %vm395_vm3, %v340_v55  ;;  %v360_v4 = vpop.permute.xlu1 %359 }
 0x595   :  { %1533 = vmatprep.mubr.msk.f32.mxu0 %vm395_vm3, %v341_v56 }
 0x598   :  { %1534 = vmatmul.mubr.msk.f32.gmra.mrb[2].mxu0 %vm395_vm3, %v342_v57 }
 0x59c   :  { %v355_v58 = vpop.permute.xlu0 %354 }
 0x5a0   :  { %v365_v1 = vpop.permute.xlu0 %364 }
 0x667   :  { %v1532_v60 = vpop.f32.mrb[0].mxu0 }
 0x668   :  { %v480_v61 = vadd.f32 %v1532_v60, %v355_v58  ;;  %v474_v62 = vpop.f32.mrb[1].mxu0 }
 0x669   :  { %v475_v63 = vadd.f32 %v474_v62, %v350_v59 }
 0x66a   :  { %v494_v0 = vmax.f32 %v480_v61, 0.0 }
 0x66b   :  { %v493_v2 = vmax.f32 %v475_v63, 0.0  ;;  %v1535_v3 = vpop.f32.mrb[2].mxu0 }
 0x66c   :  { %v490_v5 = vadd.f32 %v1535_v3, %v365_v1  ;;  %500 = vrot.lane.b32.xlu0 %v494_v0, %s1999_s28  ;;  %v484_v6 = vpop.f32.mrb[3].mxu0 }
 0x66d   :  { %v485_v7 = vadd.f32 %v484_v6, %v360_v4  ;;  %497 = vrot.lane.b32.xlu1 %v493_v2, %s1999_s28 }
 0x66e   :  { %v496_v8 = vmax.f32 %v490_v5, 0.0 }
 0x66f   :  { %v495_v9 = vmax.f32 %v485_v7, 0.0 }
 0x670   :  { %506 = vrot.lane.b32.xlu0 %v496_v8, %s1999_s28 }
 0x671   :  { %503 = vrot.lane.b32.xlu1 %v495_v9, %s1999_s28 }
 0x6de   :  { %v501_v10 = vpop.permute.xlu0 %500 }
 0x6df   :  { %v498_v11 = vpop.permute.xlu1 %497  ;;  %v502_v12 = vsel %vm40_vm2, %v501_v10, %v494_v0 }
 0x6e0   :  { %511 = vrot.lane.b32.xlu0 %v502_v12, %s1999_s28  ;;  %v499_v13 = vsel %vm40_vm2, %v498_v11, %v493_v2 }
 0x6e1   :  { %509 = vrot.lane.b32.xlu1 %v499_v13, %s1999_s28 }
 0x6e2   :  { %v507_v14 = vpop.permute.xlu0 %506 }
 0x6e3   :  { %v504_v15 = vpop.permute.xlu1 %503  ;;  %v508_v16 = vsel %vm40_vm2, %v507_v14, %v496_v8 }
 0x6e4   :  { %515 = vrot.lane.b32.xlu0 %v508_v16, %s1999_s28  ;;  %v505_v17 = vsel %vm40_vm2, %v504_v15, %v495_v9 }
 0x6e5   :  { %513 = vrot.lane.b32.xlu1 %v505_v17, %s1999_s28 }
 0x6e8   :  { %531 = vrot.lane.b32.xlu0 %v494_v0, %s2004_s12 }
 0x6e9   :  { %529 = vrot.lane.b32.xlu1 %v493_v2, %s2004_s12 }
 0x6ec   :  { %535 = vrot.lane.b32.xlu0 %v496_v8, %s2004_s12 }
 0x6ed   :  { %533 = vrot.lane.b32.xlu1 %v495_v9, %s2004_s12 }
 0x752   :  { %v512_v18 = vpop.permute.xlu0 %511 }
 0x753   :  { %v518_v19 = vsel %vm40_vm2, %v512_v18, %v494_v0  ;;  %v510_v20 = vpop.permute.xlu1 %509 }
 0x754   :  { %v546_v21 = vmul.f32 %v518_v19, %v2094_v33  ;;  %v517_v22 = vsel %vm40_vm2, %v510_v20, %v493_v2  ;;  %v522_v34 = vmul.f32 %v518_v19, %v2103_v45 }
 0x755   :  { %v545_v23 = vmul.f32 %v517_v22, %v2094_v33  ;;  %v521_v36 = vmul.f32 %v517_v22, %v2103_v45 }
 0x756   :  { %555 = vrot.lane.b32.xlu0 %v546_v21, %s2005_s2  ;;  %v516_v24 = vpop.permute.xlu0 %515  ;;  %v1399_v21 = vld [vmem:[%s2528_s3 + $0x20] sm:$0xff] }
 0x757   :  { %v520_v25 = vsel %vm40_vm2, %v516_v24, %v496_v8  ;;  %553 = vrot.lane.b32.xlu1 %v545_v23, %s2005_s2  ;;  %v514_v26 = vpop.permute.xlu1 %513  ;;  %1560 = vmatprep.mubr.msk.f32.mxu1 %vm395_vm3, %v1399_v21 }
 0x758   :  { %v548_v27 = vmul.f32 %v520_v25, %v2094_v33  ;;  %v519_v28 = vsel %vm40_vm2, %v514_v26, %v495_v9  ;;  %v524_v40 = vmul.f32 %v520_v25, %v2103_v45 }
 0x759   :  { %v547_v29 = vmul.f32 %v519_v28, %v2094_v33  ;;  %v523_v43 = vmul.f32 %v519_v28, %v2103_v45 }
 0x75a   :  { %559 = vrot.lane.b32.xlu0 %v548_v27, %s2005_s2  ;;  %v532_v30 = vpop.permute.xlu0 %531  ;;  %v1403_v27 = vld [vmem:[%s2529_s4 + $0x20] sm:$0xff] }
 0x75b   :  { %557 = vrot.lane.b32.xlu1 %v547_v29, %s2005_s2  ;;  %v530_v31 = vpop.permute.xlu1 %529  ;;  %v542_v37 = vmax.f32 %v522_v34, %v532_v30  ;;  %v1405_v34 = vld [vmem:[%s2529_s4 + $0x30] sm:$0xff] }
 0x75c   :  { %v541_v38 = vmax.f32 %v521_v36, %v530_v31  ;;  %v1404_v31 = vld [vmem:[%s2529_s4 + $0x28] sm:$0xff]  ;;  %v1406_v36 = vld [vmem:[%s2529_s4 + $0x38] sm:$0xff] }
 0x75e   :  { %v536_v32 = vpop.permute.xlu0 %535 }
 0x75f   :  { %v534_v35 = vpop.permute.xlu1 %533  ;;  %v544_v46 = vmax.f32 %v524_v40, %v536_v32 }
 0x760   :  { %v543_v47 = vmax.f32 %v523_v43, %v534_v35 }
 0x7c8   :  { %v556_v39 = vpop.permute.xlu0 %555 }
 0x7c9   :  { %v566_v41 = vmax.f32 %v542_v37, %v556_v39  ;;  %v554_v42 = vpop.permute.xlu1 %553 }
 0x7ca   :  { %v565_v44 = vmax.f32 %v541_v38, %v554_v42 }
 0x7cb   :  { %575 = vrot.lane.b32.xlu0 %v566_v41, %s2006_s20 }
 0x7cc   :  { %v560_v48 = vpop.permute.xlu0 %559  ;;  %573 = vrot.lane.b32.xlu1 %v565_v44, %s2006_s20 }
 0x7cd   :  { %v568_v49 = vmax.f32 %v544_v46, %v560_v48  ;;  %v558_v50 = vpop.permute.xlu1 %557  ;;  %v1401_v48 = vld [vmem:[%s2528_s3 + $0x30] sm:$0xff] }
 0x7ce   :  { %v567_v51 = vmax.f32 %v543_v47, %v558_v50  ;;  %v1400_v47 = vld [vmem:[%s2528_s3 + $0x28] sm:$0xff] }
 0x7cf   :  { %579 = vrot.lane.b32.xlu0 %v568_v49, %s2006_s20  ;;  %v1402_v49 = vld [vmem:[%s2528_s3 + $0x38] sm:$0xff] }
 0x7d0   :  { %577 = vrot.lane.b32.xlu1 %v567_v51, %s2006_s20 }
 0x83d   :  { %v2260_v52 = vpop.permute.xlu0 %575 }
 0x83e   :  { %588 = vrot.lane.b32.xlu0 %v2260_v52, %s1999_s28  ;;  %v2264_v53 = vpop.permute.xlu1 %573 }
 0x83f   :  { %585 = vrot.lane.b32.xlu1 %v2264_v53, %s1999_s28  ;;  %v1628_v35 = vpack.c.bf16 %v2260_v52, %v2264_v53 }
 0x841   :  { %v2268_v54 = vpop.permute.xlu0 %579 }
 0x842   :  { %594 = vrot.lane.b32.xlu0 %v2268_v54, %s1999_s28  ;;  %v2272_v55 = vpop.permute.xlu1 %577 }
 0x843   :  { %591 = vrot.lane.b32.xlu1 %v2272_v55, %s1999_s28  ;;  %v1632_v37 = vpack.c.bf16 %v2268_v54, %v2272_v55 }
 0x8b0   :  { %v589_v56 = vpop.permute.xlu0 %588 }
 0x8b1   :  { %v586_v57 = vpop.permute.xlu1 %585  ;;  %v590_v58 = vsel %vm40_vm2, %v589_v56, %v2260_v52 }
 0x8b2   :  { %599 = vrot.lane.b32.xlu0 %v590_v58, %s1999_s28  ;;  %v587_v59 = vsel %vm40_vm2, %v586_v57, %v2264_v53 }
 0x8b3   :  { %597 = vrot.lane.b32.xlu1 %v587_v59, %s1999_s28 }
 0x8b4   :  { %v595_v60 = vpop.permute.xlu0 %594 }
 0x8b5   :  { %v592_v61 = vpop.permute.xlu1 %591  ;;  %v596_v62 = vsel %vm40_vm2, %v595_v60, %v2268_v54 }
 0x8b6   :  { %603 = vrot.lane.b32.xlu0 %v596_v62, %s1999_s28  ;;  %v593_v63 = vsel %vm40_vm2, %v592_v61, %v2272_v55 }
 0x8b7   :  { %601 = vrot.lane.b32.xlu1 %v593_v63, %s1999_s28 }
 0x924   :  { %v600_v0 = vpop.permute.xlu0 %599 }
 0x925   :  { %v606_v1 = vsel %vm40_vm2, %v600_v0, %v2260_v52  ;;  %v598_v2 = vpop.permute.xlu1 %597 }
 0x926   :  { %v614_v3 = vmul.f32 %v606_v1, %v2094_v33  ;;  %v605_v4 = vsel %vm40_vm2, %v598_v2, %v2264_v53  ;;  %v610_v7 = vmul.f32 %v606_v1, %v2103_v45 }
 0x927   :  { %v613_v5 = vmul.f32 %v605_v4, %v2094_v33  ;;  %v609_v8 = vmul.f32 %v605_v4, %v2103_v45 }
 0x928   :  { %v604_v6 = vpop.permute.xlu0 %603 }
 0x929   :  { %v608_v9 = vsel %vm40_vm2, %v604_v6, %v2268_v54  ;;  %v602_v10 = vpop.permute.xlu1 %601  ;;  %v1754_v11 = vpack.i.bf16 %v614_v3, %v613_v5  ;;  %v1764_v15 = vpack.i.bf16 %v610_v7, %v609_v8 }
 0x92a   :  { %v616_v12 = vmul.f32 %v608_v9, %v2094_v33  ;;  %v607_v13 = vsel %vm40_vm2, %v602_v10, %v2272_v55  ;;  %v612_v16 = vmul.f32 %v608_v9, %v2103_v45 }
 0x92b   :  { %v615_v14 = vmul.f32 %v607_v13, %v2094_v33  ;;  %1755 = vrot.lane.b32.xlu1 %v1754_v11, %s2005_s2  ;;  %v611_v17 = vmul.f32 %v607_v13, %v2103_v45 }
 0x92d   :  { %v1759_v18 = vpack.i.bf16 %v616_v12, %v615_v14  ;;  %v1769_v19 = vpack.i.bf16 %v612_v16, %v611_v17 }
 0x92f   :  { %1765 = vrot.lane.b32.xlu1 %v1764_v15, %s2006_s20  ;;  %1760 = vrot.lane.b32.xlu0 %v1759_v18, %s2005_s2 }
 0x933   :  { %1770 = vrot.lane.b32.xlu0 %v1769_v19, %s2006_s20 }
 0x99d   :  { %v1756_v20 = vpop.permute.xlu1 %1755 }
 0x99e   :  { %1775 = vrot.lane.b32.xlu1 %v1756_v20, %s2006_s20 }
 0x9a1   :  { %v1761_v22 = vpop.permute.xlu0 %1760  ;;  %v1766_v23 = vpop.permute.xlu1 %1765 }
 0x9a2   :  { %v1768_v24 = vunpack.i.h.bf16 %v1766_v23  ;;  %v1767_v25 = vunpack.i.l.bf16 %v1766_v23  ;;  %1780 = vrot.lane.b32.xlu0 %v1761_v22, %s2006_s20  ;;  %641 = vperm.xlu1 %1722, %v1403_v27  }
 0x9a4   :  { %v1620_v26 = vpack.c.bf16 %v1768_v24, %v1767_v25 }
 0x9a5   :  { %v1771_v28 = vpop.permute.xlu0 %1770 }
 0x9a6   :  { %v1773_v29 = vunpack.i.h.bf16 %v1771_v28  ;;  %v1772_v30 = vunpack.i.l.bf16 %v1771_v28  ;;  %1621 = vmatprep.subr.bf16.mxu1 %v1620_v26  ;;  %646 = vperm.xlu0 %1723, %v1404_v31  }
 0x9a7   :  { %1623 = vmatpush3.bf16.msra.mxu1 %v1620_v26  ;;  %651 = vperm.xlu1 %1722, %v1405_v34  }
 0x9a8   :  { %v1624_v32 = vpack.c.bf16 %v1773_v29, %v1772_v30 }
 0x9aa   :  { %1625 = vmatprep.subr.bf16.mxu1 %v1624_v32  ;;  %656 = vperm.xlu0 %1723, %v1406_v36  }
 0x9ab   :  { %1627 = vmatpush3.bf16.msra.mxu1 %v1624_v32 }
 0x9ac   :  { %1629 = vmatprep.subr.bf16.mxu1 %v1628_v35 }
 0x9af   :  { %1631 = vmatpush3.bf16.msra.mxu1 %v1628_v35 }
 0x9b0   :  { %1633 = vmatprep.subr.bf16.mxu1 %v1632_v37 }
 0x9b3   :  { %1635 = vmatpush3.bf16.msra.mxu1 %v1632_v37 }
 0xa10   :  { %v1776_v38 = vpop.permute.xlu1 %1775 }
 0xa11   :  { %v1778_v39 = vunpack.i.h.bf16 %v1776_v38  ;;  %v1777_v40 = vunpack.i.l.bf16 %v1776_v38 }
 0xa13   :  { %v1636_v41 = vpack.c.bf16 %v1778_v39, %v1777_v40 }
 0xa14   :  { %v1781_v42 = vpop.permute.xlu0 %1780 }
 0xa15   :  { %v1783_v43 = vunpack.i.h.bf16 %v1781_v42  ;;  %v1782_v44 = vunpack.i.l.bf16 %v1781_v42  ;;  %1637 = vmatprep.subr.bf16.mxu1 %v1636_v41 }
 0xa16   :  { %1639 = vmatpush3.bf16.msra.mxu1 %v1636_v41 }
 0xa17   :  { %v1640_v46 = vpack.c.bf16 %v1783_v43, %v1782_v44 }
 0xa19   :  { %1641 = vmatprep.subr.bf16.mxu1 %v1640_v46 }
 0xa1a   :  { %1643 = vmatpush3.bf16.msra.mxu1 %v1640_v46 }
 0xa1d   :  { %1561 = vmatmul.mubr.msk.f32.vlgmr.msra.gmra.mrb[0].mxu1 %vm395_vm3, %v1400_v47 }
 0xa1e   :  { %1563 = vmatprep.mubr.msk.f32.mxu1 %vm395_vm3, %v1401_v48 }
 0xa21   :  { %1564 = vmatmul.mubr.msk.f32.gmra.mrb[2].mxu1 %vm395_vm3, %v1402_v49  ;;  %v642_v51 = vpop.permute.xlu1 %641 }
 0xa25   :  { %v647_v50 = vpop.permute.xlu0 %646 }
 0xa26   :  { %v652_v60 = vpop.permute.xlu1 %651 }
 0xa29   :  { %v657_v57 = vpop.permute.xlu0 %656 }
 0xaf0   :  { %v1562_v52 = vpop.f32.mrb[0].mxu1 }
 0xaf1   :  { %v771_v53 = vadd.f32 %v1562_v52, %v647_v50  ;;  %v765_v54 = vpop.f32.mrb[1].mxu1 }
 0xaf2   :  { %v766_v55 = vadd.f32 %v765_v54, %v642_v51 }
 0xaf3   :  { %v785_v56 = vmax.f32 %v771_v53, 0.0 }
 0xaf4   :  { %v784_v58 = vmax.f32 %v766_v55, 0.0  ;;  %v1565_v59 = vpop.f32.mrb[2].mxu1 }
 0xaf5   :  { %v781_v61 = vadd.f32 %v1565_v59, %v657_v57  ;;  %791 = vrot.lane.b32.xlu0 %v785_v56, %s1999_s28  ;;  %v775_v62 = vpop.f32.mrb[3].mxu1 }
 0xaf6   :  { %v776_v63 = vadd.f32 %v775_v62, %v652_v60  ;;  %788 = vrot.lane.b32.xlu1 %v784_v58, %s1999_s28 }
 0xaf7   :  { %v787_v0 = vmax.f32 %v781_v61, 0.0 }
 0xaf8   :  { %v786_v1 = vmax.f32 %v776_v63, 0.0 }
 0xaf9   :  { %797 = vrot.lane.b32.xlu0 %v787_v0, %s1999_s28 }
 0xafa   :  { %794 = vrot.lane.b32.xlu1 %v786_v1, %s1999_s28 }
 0xb67   :  { %v792_v2 = vpop.permute.xlu0 %791 }
 0xb68   :  { %v793_v3 = vsel %vm40_vm2, %v792_v2, %v785_v56  ;;  %v789_v4 = vpop.permute.xlu1 %788 }
 0xb69   :  { %v790_v5 = vsel %vm40_vm2, %v789_v4, %v784_v58  ;;  %802 = vrot.lane.b32.xlu0 %v793_v3, %s1999_s28 }
 0xb6a   :  { %800 = vrot.lane.b32.xlu1 %v790_v5, %s1999_s28 }
 0xb6b   :  { %v798_v6 = vpop.permute.xlu0 %797 }
 0xb6c   :  { %v799_v7 = vsel %vm40_vm2, %v798_v6, %v787_v0  ;;  %v795_v8 = vpop.permute.xlu1 %794 }
 0xb6d   :  { %v796_v9 = vsel %vm40_vm2, %v795_v8, %v786_v1  ;;  %806 = vrot.lane.b32.xlu0 %v799_v7, %s1999_s28 }
 0xb6e   :  { %804 = vrot.lane.b32.xlu1 %v796_v9, %s1999_s28 }
 0xb71   :  { %822 = vrot.lane.b32.xlu0 %v785_v56, %s2004_s12 }
 0xb72   :  { %820 = vrot.lane.b32.xlu1 %v784_v58, %s2004_s12 }
 0xb75   :  { %826 = vrot.lane.b32.xlu0 %v787_v0, %s2004_s12 }
 0xb76   :  { %824 = vrot.lane.b32.xlu1 %v786_v1, %s2004_s12 }
 0xbdb   :  { %v803_v10 = vpop.permute.xlu0 %802 }
 0xbdc   :  { %v809_v11 = vsel %vm40_vm2, %v803_v10, %v785_v56  ;;  %v801_v12 = vpop.permute.xlu1 %800 }
 0xbdd   :  { %v837_v13 = vmul.f32 %v809_v11, %v2094_v33  ;;  %v808_v14 = vsel %vm40_vm2, %v801_v12, %v784_v58  ;;  %v813_v25 = vmul.f32 %v809_v11, %v2103_v45 }
 0xbde   :  { %v836_v15 = vmul.f32 %v808_v14, %v2094_v33  ;;  %v812_v27 = vmul.f32 %v808_v14, %v2103_v45 }
 0xbdf   :  { %846 = vrot.lane.b32.xlu0 %v837_v13, %s2005_s2  ;;  %v807_v16 = vpop.permute.xlu0 %806  ;;  %v1411_v13 = vld [vmem:[%s2528_s3 + $0x40] sm:$0xff] }
 0xbe0   :  { %v811_v17 = vsel %vm40_vm2, %v807_v16, %v787_v0  ;;  %844 = vrot.lane.b32.xlu1 %v836_v15, %s2005_s2  ;;  %v805_v18 = vpop.permute.xlu1 %804  ;;  %1590 = vmatprep.mubr.msk.f32.mxu0 %vm395_vm3, %v1411_v13 }
 0xbe1   :  { %v839_v19 = vmul.f32 %v811_v17, %v2094_v33  ;;  %v810_v20 = vsel %vm40_vm2, %v805_v18, %v786_v1  ;;  %v815_v31 = vmul.f32 %v811_v17, %v2103_v45 }
 0xbe2   :  { %v838_v21 = vmul.f32 %v810_v20, %v2094_v33  ;;  %v814_v35 = vmul.f32 %v810_v20, %v2103_v45 }
 0xbe3   :  { %850 = vrot.lane.b32.xlu0 %v839_v19, %s2005_s2  ;;  %v823_v22 = vpop.permute.xlu0 %822  ;;  %v1415_v19 = vld [vmem:[%s2529_s4 + $0x40] sm:$0xff] }
 0xbe4   :  { %848 = vrot.lane.b32.xlu1 %v838_v21, %s2005_s2  ;;  %v821_v23 = vpop.permute.xlu1 %820  ;;  %v833_v28 = vmax.f32 %v813_v25, %v823_v22  ;;  %v1417_v25 = vld [vmem:[%s2529_s4 + $0x50] sm:$0xff] }
 0xbe5   :  { %v832_v29 = vmax.f32 %v812_v27, %v821_v23  ;;  %v1416_v23 = vld [vmem:[%s2529_s4 + $0x48] sm:$0xff]  ;;  %v1418_v27 = vld [vmem:[%s2529_s4 + $0x58] sm:$0xff] }
 0xbe7   :  { %v827_v24 = vpop.permute.xlu0 %826 }
 0xbe8   :  { %v825_v26 = vpop.permute.xlu1 %824  ;;  %v835_v37 = vmax.f32 %v815_v31, %v827_v24 }
 0xbe9   :  { %v834_v38 = vmax.f32 %v814_v35, %v825_v26 }
 0xc51   :  { %v847_v30 = vpop.permute.xlu0 %846 }
 0xc52   :  { %v857_v32 = vmax.f32 %v833_v28, %v847_v30  ;;  %v845_v34 = vpop.permute.xlu1 %844 }
 0xc53   :  { %v856_v36 = vmax.f32 %v832_v29, %v845_v34 }
 0xc54   :  { %866 = vrot.lane.b32.xlu0 %v857_v32, %s2006_s20 }
 0xc55   :  { %v851_v39 = vpop.permute.xlu0 %850  ;;  %864 = vrot.lane.b32.xlu1 %v856_v36, %s2006_s20 }
 0xc56   :  { %v859_v40 = vmax.f32 %v835_v37, %v851_v39  ;;  %v849_v41 = vpop.permute.xlu1 %848  ;;  %v1413_v39 = vld [vmem:[%s2528_s3 + $0x50] sm:$0xff] }
 0xc57   :  { %v858_v42 = vmax.f32 %v834_v38, %v849_v41  ;;  %v1412_v38 = vld [vmem:[%s2528_s3 + $0x48] sm:$0xff] }
 0xc58   :  { %870 = vrot.lane.b32.xlu0 %v859_v40, %s2006_s20  ;;  %v1414_v40 = vld [vmem:[%s2528_s3 + $0x58] sm:$0xff]  ;;  %s2007_s3 = smov 96  }
 0xc59   :  { %868 = vrot.lane.b32.xlu1 %v858_v42, %s2006_s20 }
 0xcc6   :  { %v2378_v43 = vpop.permute.xlu0 %866 }
 0xcc7   :  { %879 = vrot.lane.b32.xlu0 %v2378_v43, %s1999_s28  ;;  %v2382_v44 = vpop.permute.xlu1 %864 }
 0xcc8   :  { %876 = vrot.lane.b32.xlu1 %v2382_v44, %s1999_s28  ;;  %v1652_v26 = vpack.c.bf16 %v2378_v43, %v2382_v44 }
 0xcca   :  { %v2386_v46 = vpop.permute.xlu0 %870 }
 0xccb   :  { %885 = vrot.lane.b32.xlu0 %v2386_v46, %s1999_s28  ;;  %v2390_v47 = vpop.permute.xlu1 %868 }
 0xccc   :  { %882 = vrot.lane.b32.xlu1 %v2390_v47, %s1999_s28  ;;  %v1656_v28 = vpack.c.bf16 %v2386_v46, %v2390_v47 }
 0xd39   :  { %v880_v48 = vpop.permute.xlu0 %879 }
 0xd3a   :  { %v881_v49 = vsel %vm40_vm2, %v880_v48, %v2378_v43  ;;  %v877_v50 = vpop.permute.xlu1 %876 }
 0xd3b   :  { %v878_v51 = vsel %vm40_vm2, %v877_v50, %v2382_v44  ;;  %890 = vrot.lane.b32.xlu0 %v881_v49, %s1999_s28 }
 0xd3c   :  { %888 = vrot.lane.b32.xlu1 %v878_v51, %s1999_s28 }
 0xd3d   :  { %v886_v52 = vpop.permute.xlu0 %885 }
 0xd3e   :  { %v887_v53 = vsel %vm40_vm2, %v886_v52, %v2386_v46  ;;  %v883_v54 = vpop.permute.xlu1 %882 }
 0xd3f   :  { %v884_v55 = vsel %vm40_vm2, %v883_v54, %v2390_v47  ;;  %894 = vrot.lane.b32.xlu0 %v887_v53, %s1999_s28 }
 0xd40   :  { %892 = vrot.lane.b32.xlu1 %v884_v55, %s1999_s28 }
 0xdad   :  { %v891_v56 = vpop.permute.xlu0 %890 }
 0xdae   :  { %v897_v57 = vsel %vm40_vm2, %v891_v56, %v2378_v43  ;;  %v889_v58 = vpop.permute.xlu1 %888 }
 0xdaf   :  { %v905_v59 = vmul.f32 %v897_v57, %v2094_v33  ;;  %v896_v60 = vsel %vm40_vm2, %v889_v58, %v2382_v44  ;;  %v901_v63 = vmul.f32 %v897_v57, %v2103_v45 }
 0xdb0   :  { %v904_v61 = vmul.f32 %v896_v60, %v2094_v33  ;;  %v900_v1 = vmul.f32 %v896_v60, %v2103_v45 }
 0xdb1   :  { %v895_v62 = vpop.permute.xlu0 %894 }
 0xdb2   :  { %v1784_v0 = vpack.i.bf16 %v905_v59, %v904_v61  ;;  %v899_v2 = vsel %vm40_vm2, %v895_v62, %v2386_v46  ;;  %v893_v3 = vpop.permute.xlu1 %892  ;;  %v1794_v7 = vpack.i.bf16 %v901_v63, %v900_v1 }
 0xdb3   :  { %v907_v4 = vmul.f32 %v899_v2, %v2094_v33  ;;  %v898_v5 = vsel %vm40_vm2, %v893_v3, %v2390_v47  ;;  %v903_v8 = vmul.f32 %v899_v2, %v2103_v45 }
 0xdb4   :  { %v906_v6 = vmul.f32 %v898_v5, %v2094_v33  ;;  %1785 = vrot.lane.b32.xlu1 %v1784_v0, %s2005_s2  ;;  %v902_v10 = vmul.f32 %v898_v5, %v2103_v45 }
 0xdb6   :  { %v1789_v9 = vpack.i.bf16 %v907_v4, %v906_v6  ;;  %v1799_v11 = vpack.i.bf16 %v903_v8, %v902_v10 }
 0xdb8   :  { %1795 = vrot.lane.b32.xlu1 %v1794_v7, %s2006_s20  ;;  %1790 = vrot.lane.b32.xlu0 %v1789_v9, %s2005_s2 }
 0xdbc   :  { %1800 = vrot.lane.b32.xlu0 %v1799_v11, %s2006_s20 }
 0xe26   :  { %v1786_v12 = vpop.permute.xlu1 %1785 }
 0xe27   :  { %1805 = vrot.lane.b32.xlu1 %v1786_v12, %s2006_s20 }
 0xe2a   :  { %v1791_v14 = vpop.permute.xlu0 %1790  ;;  %v1796_v15 = vpop.permute.xlu1 %1795 }
 0xe2b   :  { %v1798_v16 = vunpack.i.h.bf16 %v1796_v15  ;;  %v1797_v17 = vunpack.i.l.bf16 %v1796_v15  ;;  %1810 = vrot.lane.b32.xlu0 %v1791_v14, %s2006_s20  ;;  %932 = vperm.xlu1 %1722, %v1415_v19  }
 0xe2d   :  { %v1644_v18 = vpack.c.bf16 %v1798_v16, %v1797_v17 }
 0xe2e   :  { %v1801_v20 = vpop.permute.xlu0 %1800 }
 0xe2f   :  { %v1803_v21 = vunpack.i.h.bf16 %v1801_v20  ;;  %v1802_v22 = vunpack.i.l.bf16 %v1801_v20  ;;  %1645 = vmatprep.subr.bf16.mxu0 %v1644_v18  ;;  %937 = vperm.xlu0 %1723, %v1416_v23  }
 0xe30   :  { %1647 = vmatpush3.bf16.msra.mxu0 %v1644_v18  ;;  %942 = vperm.xlu1 %1722, %v1417_v25  }
 0xe31   :  { %v1648_v24 = vpack.c.bf16 %v1803_v21, %v1802_v22 }
 0xe33   :  { %1649 = vmatprep.subr.bf16.mxu0 %v1648_v24  ;;  %947 = vperm.xlu0 %1723, %v1418_v27  }
 0xe34   :  { %1651 = vmatpush3.bf16.msra.mxu0 %v1648_v24 }
 0xe35   :  { %1653 = vmatprep.subr.bf16.mxu0 %v1652_v26 }
 0xe38   :  { %1655 = vmatpush3.bf16.msra.mxu0 %v1652_v26 }
 0xe39   :  { %1657 = vmatprep.subr.bf16.mxu0 %v1656_v28 }
 0xe3c   :  { %1659 = vmatpush3.bf16.msra.mxu0 %v1656_v28 }
 0xe99   :  { %v1806_v29 = vpop.permute.xlu1 %1805 }
 0xe9a   :  { %v1808_v30 = vunpack.i.h.bf16 %v1806_v29  ;;  %v1807_v31 = vunpack.i.l.bf16 %v1806_v29 }
 0xe9c   :  { %v1660_v32 = vpack.c.bf16 %v1808_v30, %v1807_v31 }
 0xe9d   :  { %v1811_v34 = vpop.permute.xlu0 %1810 }
 0xe9e   :  { %v1813_v35 = vunpack.i.h.bf16 %v1811_v34  ;;  %v1812_v36 = vunpack.i.l.bf16 %v1811_v34  ;;  %1661 = vmatprep.subr.bf16.mxu0 %v1660_v32 }
 0xe9f   :  { %1663 = vmatpush3.bf16.msra.mxu0 %v1660_v32 }
 0xea0   :  { %v1664_v37 = vpack.c.bf16 %v1813_v35, %v1812_v36 }
 0xea2   :  { %1665 = vmatprep.subr.bf16.mxu0 %v1664_v37 }
 0xea3   :  { %1667 = vmatpush3.bf16.msra.mxu0 %v1664_v37 }
 0xea6   :  { %1591 = vmatmul.mubr.msk.f32.vlgmr.msra.gmra.mrb[4].mxu0 %vm395_vm3, %v1412_v38 }
 0xea7   :  { %1593 = vmatprep.mubr.msk.f32.mxu0 %vm395_vm3, %v1413_v39 }
 0xeaa   :  { %1594 = vmatmul.mubr.msk.f32.gmra.mrb[6].mxu0 %vm395_vm3, %v1414_v40  ;;  %v933_v42 = vpop.permute.xlu1 %932 }
 0xeae   :  { %v938_v41 = vpop.permute.xlu0 %937 }
 0xeaf   :  { %v943_v52 = vpop.permute.xlu1 %942 }
 0xeb2   :  { %v948_v49 = vpop.permute.xlu0 %947 }
 0xf79   :  { %v1592_v43 = vpop.f32.mrb[4].mxu0 }
 0xf7a   :  { %v1062_v44 = vadd.f32 %v1592_v43, %v938_v41  ;;  %v1056_v46 = vpop.f32.mrb[5].mxu0 }
 0xf7b   :  { %v1057_v47 = vadd.f32 %v1056_v46, %v933_v42 }
 0xf7c   :  { %v1076_v48 = vmax.f32 %v1062_v44, 0.0 }
 0xf7d   :  { %v1075_v50 = vmax.f32 %v1057_v47, 0.0  ;;  %v1595_v51 = vpop.f32.mrb[6].mxu0 }
 0xf7e   :  { %v1072_v53 = vadd.f32 %v1595_v51, %v948_v49  ;;  %1082 = vrot.lane.b32.xlu0 %v1076_v48, %s1999_s28  ;;  %v1066_v54 = vpop.f32.mrb[7].mxu0 }
 0xf7f   :  { %v1067_v55 = vadd.f32 %v1066_v54, %v943_v52  ;;  %1079 = vrot.lane.b32.xlu1 %v1075_v50, %s1999_s28  ;;  %v1814_v2 = vpack.i.bf16 %v1076_v48, %v1075_v50 }
 0xf80   :  { %v1078_v56 = vmax.f32 %v1072_v53, 0.0 }
 0xf81   :  { %v1077_v57 = vmax.f32 %v1067_v55, 0.0 }
 0xf82   :  { %1088 = vrot.lane.b32.xlu0 %v1078_v56, %s1999_s28 }
 0xf83   :  { %1085 = vrot.lane.b32.xlu1 %v1077_v57, %s1999_s28  ;;  %v1819_v3 = vpack.i.bf16 %v1078_v56, %v1077_v57 }
 0xff0   :  { %v1083_v58 = vpop.permute.xlu0 %1082 }
 0xff1   :  { %v1084_v59 = vsel %vm40_vm2, %v1083_v58, %v1076_v48  ;;  %v1080_v60 = vpop.permute.xlu1 %1079 }
 0xff2   :  { %v1081_v61 = vsel %vm40_vm2, %v1080_v60, %v1075_v50  ;;  %1093 = vrot.lane.b32.xlu0 %v1084_v59, %s1999_s28 }
 0xff3   :  { %1091 = vrot.lane.b32.xlu1 %v1081_v61, %s1999_s28 }
 0xff4   :  { %v1089_v62 = vpop.permute.xlu0 %1088 }
 0xff5   :  { %v1090_v63 = vsel %vm40_vm2, %v1089_v62, %v1078_v56  ;;  %v1086_v0 = vpop.permute.xlu1 %1085  ;;  %v1212_v62 = vld [vmem:[%s2530_s5 + $0x8] sm:$0xff] }
 0xff6   :  { %v1087_v1 = vsel %vm40_vm2, %v1086_v0, %v1077_v57  ;;  %1097 = vrot.lane.b32.xlu0 %v1090_v63, %s1999_s28  ;;  %1371 = vmatprep.mubr.f32.mxu1 %v1212_v62 }
 0xff7   :  { %1095 = vrot.lane.b32.xlu1 %v1087_v1, %s1999_s28  ;;  %s2008_s28 = smov 88   ;;  %v1213_v1 = vld [vmem:[%s2531_s6] sm:$0xff] }
 0xffb   :  { %1815 = vrot.lane.b32.xlu1 %v1814_v2, %s2004_s12 }
 0xfff   :  { %1820 = vrot.lane.b32.xlu1 %v1819_v3, %s2004_s12  ;;  %s2009_s12 = smov 120  }
0x1064   :  { %v1094_v4 = vpop.permute.xlu0 %1093 }
0x1065   :  { %v1100_v5 = vsel %vm40_vm2, %v1094_v4, %v1076_v48  ;;  %v1092_v6 = vpop.permute.xlu1 %1091 }
0x1066   :  { %v1128_v7 = vmul.f32 %v1100_v5, %v2094_v33  ;;  %v1099_v8 = vsel %vm40_vm2, %v1092_v6, %v1075_v50  ;;  %v1104_v22 = vmul.f32 %v1100_v5, %v2103_v45 }
0x1067   :  { %v1127_v9 = vmul.f32 %v1099_v8, %v2094_v33  ;;  %v1103_v23 = vmul.f32 %v1099_v8, %v2103_v45 }
0x1068   :  { %v1098_v10 = vpop.permute.xlu0 %1097 }
0x1069   :  { %v1824_v11 = vpack.i.bf16 %v1128_v7, %v1127_v9  ;;  %v1102_v12 = vsel %vm40_vm2, %v1098_v10, %v1078_v56  ;;  %v1096_v13 = vpop.permute.xlu1 %1095 }
0x106a   :  { %v1130_v14 = vmul.f32 %v1102_v12, %v2094_v33  ;;  %v1101_v15 = vsel %vm40_vm2, %v1096_v13, %v1077_v57  ;;  %v1106_v30 = vmul.f32 %v1102_v12, %v2103_v45 }
0x106b   :  { %v1129_v16 = vmul.f32 %v1101_v15, %v2094_v33  ;;  %1825 = vrot.lane.b32.xlu0 %v1824_v11, %s2005_s2  ;;  %v1105_v31 = vmul.f32 %v1101_v15, %v2103_v45 }
0x106d   :  { %v1829_v17 = vpack.i.bf16 %v1130_v14, %v1129_v16  ;;  %v1816_v18 = vpop.permute.xlu1 %1815 }
0x106e   :  { %v1818_v19 = vunpack.i.h.bf16 %v1816_v18  ;;  %v1817_v20 = vunpack.i.l.bf16 %v1816_v18 }
0x106f   :  { %1830 = vrot.lane.b32.xlu0 %v1829_v17, %s2005_s2  ;;  %s2010_s2 = smov 80  }
0x1070   :  { %v1124_v27 = vmax.f32 %v1104_v22, %v1818_v19  ;;  %v1123_v28 = vmax.f32 %v1103_v23, %v1817_v20 }
0x1071   :  { %v1821_v21 = vpop.permute.xlu1 %1820 }
0x1072   :  { %v1823_v24 = vunpack.i.h.bf16 %v1821_v21  ;;  %v1822_v25 = vunpack.i.l.bf16 %v1821_v21 }
0x1074   :  { %v1126_v35 = vmax.f32 %v1106_v30, %v1823_v24  ;;  %v1125_v36 = vmax.f32 %v1105_v31, %v1822_v25 }
0x10dd   :  { %v1826_v26 = vpop.permute.xlu0 %1825 }
0x10de   :  { %v1828_v29 = vunpack.i.h.bf16 %v1826_v26  ;;  %v1827_v33 = vunpack.i.l.bf16 %v1826_v26 }
0x10e0   :  { %v1147_v32 = vmax.f32 %v1123_v28, %v1827_v33  ;;  %v1148_v34 = vmax.f32 %v1124_v27, %v1828_v29 }
0x10e1   :  { %v1831_v37 = vpop.permute.xlu0 %1830 }
0x10e2   :  { %v1833_v38 = vunpack.i.h.bf16 %v1831_v37  ;;  %v1832_v39 = vunpack.i.l.bf16 %v1831_v37  ;;  %v1834_v40 = vpack.i.bf16 %v1148_v34, %v1147_v32 }
0x10e4   :  { %v1149_v41 = vmax.f32 %v1125_v36, %v1832_v39  ;;  %v1150_v42 = vmax.f32 %v1126_v35, %v1833_v38  ;;  %1835 = vrot.lane.b32.xlu1 %v1834_v40, %s2007_s3 }
0x10e6   :  { %v1839_v43 = vpack.i.bf16 %v1150_v42, %v1149_v41 }
0x10e8   :  { %1840 = vrot.lane.b32.xlu0 %v1839_v43, %s2007_s3  ;;  %1845 = vrot.lane.b32.xlu1 %v1834_v40, %s2008_s28 }
0x10ec   :  { %1850 = vrot.lane.b32.xlu0 %v1834_v40, %s2009_s12  ;;  %1855 = vrot.lane.b32.xlu1 %v1839_v43, %s2008_s28 }
0x10f0   :  { %1865 = vrot.lane.b32.xlu0 %v1839_v43, %s2009_s12  ;;  %1860 = vrot.lane.b32.xlu1 %v1834_v40, %s2010_s2 }
0x10f4   :  { %1870 = vrot.lane.b32.xlu0 %v1834_v40, %s2011_s24  ;;  %1875 = vrot.lane.b32.xlu1 %v1839_v43, %s2010_s2 }
0x10f8   :  { %1885 = vrot.lane.b32.xlu0 %v1839_v43, %s2011_s24  ;;  %1880 = vrot.lane.b32.xlu1 %v1834_v40, %s2006_s20 }
0x10fc   :  { %1890 = vrot.lane.b32.xlu0 %v1834_v40, %s2012_s25  ;;  %1895 = vrot.lane.b32.xlu1 %v1839_v43, %s2006_s20 }
0x1100   :  { %1900 = vrot.lane.b32.xlu0 %v1839_v43, %s2012_s25 }
0x1156   :  { %v1836_v45 = vpop.permute.xlu1 %1835 }
0x1157   :  { %1905 = vrot.lane.b32.xlu1 %v1836_v45, %s2006_s20 }
0x115a   :  { %v1841_v44 = vpop.permute.xlu0 %1840  ;;  %v1846_v46 = vpop.permute.xlu1 %1845 }
0x115b   :  { %1910 = vrot.lane.b32.xlu0 %v1841_v44, %s2006_s20  ;;  %1915 = vrot.lane.b32.xlu1 %v1846_v46, %s2006_s20 }
0x115e   :  { %v1851_v47 = vpop.permute.xlu0 %1850  ;;  %v1856_v48 = vpop.permute.xlu1 %1855 }
0x115f   :  { %1920 = vrot.lane.b32.xlu0 %v1851_v47, %s2006_s20  ;;  %1925 = vrot.lane.b32.xlu1 %v1856_v48, %s2006_s20 }
0x1162   :  { %v1866_v49 = vpop.permute.xlu0 %1865  ;;  %v1861_v50 = vpop.permute.xlu1 %1860 }
0x1163   :  { %1935 = vrot.lane.b32.xlu0 %v1866_v49, %s2006_s20  ;;  %1930 = vrot.lane.b32.xlu1 %v1861_v50, %s2006_s20 }
0x1166   :  { %v1871_v51 = vpop.permute.xlu0 %1870  ;;  %v1876_v52 = vpop.permute.xlu1 %1875 }
0x1167   :  { %1940 = vrot.lane.b32.xlu0 %v1871_v51, %s2006_s20  ;;  %1945 = vrot.lane.b32.xlu1 %v1876_v52, %s2006_s20 }
0x116a   :  { %v1886_v53 = vpop.permute.xlu0 %1885  ;;  %v1881_v54 = vpop.permute.xlu1 %1880 }
0x116b   :  { %v1883_v55 = vunpack.i.h.bf16 %v1881_v54  ;;  %v1882_v56 = vunpack.i.l.bf16 %v1881_v54  ;;  %1955 = vrot.lane.b32.xlu0 %v1886_v53, %s2006_s20  ;;  %1950 = vrot.lane.b32.xlu1 %v1881_v54, %s2006_s20 }
0x116d   :  { %v1670_v57 = vpack.c.bf16 %v1883_v55, %v1882_v56 }
0x116e   :  { %v1891_v58 = vpop.permute.xlu0 %1890  ;;  %v1896_v59 = vpop.permute.xlu1 %1895 }
0x116f   :  { %v1898_v60 = vunpack.i.h.bf16 %v1896_v59  ;;  %v1897_v61 = vunpack.i.l.bf16 %v1896_v59  ;;  %1960 = vrot.lane.b32.xlu0 %v1891_v58, %s2006_s20  ;;  %1965 = vrot.lane.b32.xlu1 %v1896_v59, %s2006_s20  ;;  %v1211_v58 = vld [vmem:[%s2530_s5] sm:$0xff] }
0x1171   :  { %v1674_v63 = vpack.c.bf16 %v1898_v60, %v1897_v61 }
0x1172   :  { %v1901_v0 = vpop.permute.xlu0 %1900 }
0x1173   :  { %1970 = vrot.lane.b32.xlu0 %v1901_v0, %s2006_s20  ;;  %1216 = vperm.xlu1 %1722, %v1213_v1  }
0x11c9   :  { %v1906_v2 = vpop.permute.xlu1 %1905 }
0x11ca   :  { %v1908_v3 = vunpack.i.h.bf16 %v1906_v2  ;;  %v1907_v4 = vunpack.i.l.bf16 %v1906_v2 }
0x11cc   :  { %v1668_v5 = vpack.c.bf16 %v1908_v3, %v1907_v4 }
0x11cd   :  { %v1911_v6 = vpop.permute.xlu0 %1910  ;;  %v1916_v7 = vpop.permute.xlu1 %1915 }
0x11ce   :  { %v1913_v8 = vunpack.i.h.bf16 %v1911_v6  ;;  %v1912_v9 = vunpack.i.l.bf16 %v1911_v6  ;;  %v1918_v10 = vunpack.i.h.bf16 %v1916_v7  ;;  %v1917_v11 = vunpack.i.l.bf16 %v1916_v7  ;;  %1669 = vmatprep.subr.bf16.mxu1 %v1668_v5 }
0x11cf   :  { %1671 = vmatpush3.bf16.msra.mxu1 %v1670_v57 }
0x11d0   :  { %v1672_v12 = vpack.c.bf16 %v1913_v8, %v1912_v9  ;;  %v1676_v13 = vpack.c.bf16 %v1918_v10, %v1917_v11 }
0x11d1   :  { %v1921_v14 = vpop.permute.xlu0 %1920  ;;  %v1926_v15 = vpop.permute.xlu1 %1925 }
0x11d2   :  { %v1923_v16 = vunpack.i.h.bf16 %v1921_v14  ;;  %v1922_v17 = vunpack.i.l.bf16 %v1921_v14  ;;  %v1928_v18 = vunpack.i.h.bf16 %v1926_v15  ;;  %v1927_v19 = vunpack.i.l.bf16 %v1926_v15  ;;  %1673 = vmatprep.subr.bf16.mxu1 %v1672_v12 }
0x11d3   :  { %1675 = vmatpush3.bf16.msra.mxu1 %v1674_v63 }
0x11d4   :  { %v1678_v20 = vpack.c.bf16 %v1923_v16, %v1922_v17  ;;  %1677 = vmatprep.subr.bf16.mxu1 %v1676_v13  ;;  %v1680_v21 = vpack.c.bf16 %v1928_v18, %v1927_v19 }
0x11d5   :  { %v1936_v22 = vpop.permute.xlu0 %1935  ;;  %v1931_v23 = vpop.permute.xlu1 %1930 }
0x11d6   :  { %v1938_v24 = vunpack.i.h.bf16 %v1936_v22  ;;  %v1937_v25 = vunpack.i.l.bf16 %v1936_v22  ;;  %v1933_v26 = vunpack.i.h.bf16 %v1931_v23  ;;  %v1932_v27 = vunpack.i.l.bf16 %v1931_v23 }
0x11d7   :  { %1679 = vmatpush3.bf16.msra.mxu1 %v1678_v20 }
0x11d8   :  { %v1682_v28 = vpack.c.bf16 %v1938_v24, %v1937_v25  ;;  %1681 = vmatprep.subr.bf16.mxu1 %v1680_v21  ;;  %v1684_v29 = vpack.c.bf16 %v1933_v26, %v1932_v27 }
0x11d9   :  { %v1941_v33 = vpop.permute.xlu0 %1940  ;;  %v1946_v30 = vpop.permute.xlu1 %1945 }
0x11da   :  { %v1943_v31 = vunpack.i.h.bf16 %v1941_v33  ;;  %v1942_v32 = vunpack.i.l.bf16 %v1941_v33  ;;  %v1948_v34 = vunpack.i.h.bf16 %v1946_v30  ;;  %v1947_v35 = vunpack.i.l.bf16 %v1946_v30 }
0x11db   :  { %1683 = vmatpush3.bf16.msra.mxu1 %v1682_v28 }
0x11dc   :  { %v1686_v36 = vpack.c.bf16 %v1943_v31, %v1942_v32  ;;  %1685 = vmatprep.subr.bf16.mxu1 %v1684_v29  ;;  %v1688_v37 = vpack.c.bf16 %v1948_v34, %v1947_v35 }
0x11dd   :  { %v1956_v38 = vpop.permute.xlu0 %1955  ;;  %v1951_v39 = vpop.permute.xlu1 %1950 }
0x11de   :  { %v1958_v40 = vunpack.i.h.bf16 %v1956_v38  ;;  %v1957_v41 = vunpack.i.l.bf16 %v1956_v38  ;;  %v1953_v42 = vunpack.i.h.bf16 %v1951_v39  ;;  %v1952_v43 = vunpack.i.l.bf16 %v1951_v39 }
0x11df   :  { %1687 = vmatpush3.bf16.msra.mxu1 %v1686_v36 }
0x11e0   :  { %v1690_v45 = vpack.c.bf16 %v1958_v40, %v1957_v41  ;;  %1689 = vmatprep.subr.bf16.mxu1 %v1688_v37  ;;  %v1692_v44 = vpack.c.bf16 %v1953_v42, %v1952_v43 }
0x11e1   :  { %v1961_v46 = vpop.permute.xlu0 %1960  ;;  %v1966_v47 = vpop.permute.xlu1 %1965 }
0x11e2   :  { %v1963_v48 = vunpack.i.h.bf16 %v1961_v46  ;;  %v1962_v49 = vunpack.i.l.bf16 %v1961_v46  ;;  %v1968_v50 = vunpack.i.h.bf16 %v1966_v47  ;;  %v1967_v51 = vunpack.i.l.bf16 %v1966_v47 }
0x11e3   :  { %1691 = vmatpush3.bf16.msra.mxu1 %v1690_v45 }
0x11e4   :  { %v1694_v52 = vpack.c.bf16 %v1963_v48, %v1962_v49  ;;  %1693 = vmatprep.subr.bf16.mxu1 %v1692_v44  ;;  %v1696_v54 = vpack.c.bf16 %v1968_v50, %v1967_v51 }
0x11e5   :  { %v1971_v53 = vpop.permute.xlu0 %1970 }
0x11e6   :  { %v1973_v55 = vunpack.i.h.bf16 %v1971_v53  ;;  %v1972_v56 = vunpack.i.l.bf16 %v1971_v53 }
0x11e7   :  { %1695 = vmatpush3.bf16.msra.mxu1 %v1694_v52 }
0x11e8   :  { %v1698_v57 = vpack.c.bf16 %v1973_v55, %v1972_v56  ;;  %1697 = vmatprep.subr.bf16.mxu1 %v1696_v54 }
0x11eb   :  { %1699 = vmatpush3.bf16.msra.mxu1 %v1698_v57 }
0x11ee   :  { %1372 = vmatmul.mubr.f32.vlgmr.msra.gmra.mrb[4].mxu1 %v1211_v58 }
0x11f2   :  { %v1217_v62 = vpop.permute.xlu1 %1216 }
0x12c1   :  { %v1503_v59 = vpop.f32.mrb[4].mxu1 }
0x12c2   :  { %v1504_v60 = vpop.f32.mrb[5].mxu1 }
0x12c3   :  { %v1505_v61 = vadd.f32 %v1504_v60, %v1503_v59 }
0x12c5   :  { %v1374_v63 = vadd.f32 %v1505_v61, %v1217_v62 }
0x12c7   :  { %1378 = vst.msk [vmem:[#allocation2] sm:$0xff] %vm1377_vm4, %v1374_v63 }
0x12c8   :  { %1985 = shalt.err (!%p1982_p4)
}
0x12c9   :  { %s1986_s11 = scalar_lea.hbm %s2532_s7, 128 }
0x12ca   :  { %p1987_p5 = scmp.ne.s32.totalorder %s2532_s7, %s1986_s11  ;;  %p1990_p6 = scmp.lt.u32.totalorder %s1986_s11, %s2532_s7 }
0x12cc   :  { %p1992_p7 = pnand %p1990_p6, %p1987_p5 }
0x12ce   :  { %1995 = shalt.err (!%p1992_p7)
}
0x12cf   :  { %1388 = dma.vmem_to_hbm [thread:$0]  %s1386_s8, 128, %s2532_s7, [#allocation3]  }
0x12d0   :  { %1996 = dma.done.wait [#allocation3], 128  }
0x12d1   :  { %1997 = vsyncadd [#allocation3], 4294967168 }
0x12d2   :  { %1392 = vsyncpa [#allocation3], 1 }

</bundles_post_ra>
